<compile_context>
chip_gen: v5e
topology: v5e:2x2
jax: 0.10.0
libtpu: 0.0.40
codegen_flags: <defaults>
</compile_context>

<pallas_src>
import math

import jax
import jax.numpy as jnp
from jax.experimental import pallas as pl
from jax.experimental.pallas import tpu as pltpu  # noqa: F401  (TPU backend)

# ----- config -----
E = 16             # embedding_size
H = 32             # hidden_size
NH = 4             # num_attention_heads
HD = H // NH       # attention_head_size
I = 64             # intermediate_size
NUM_HIDDEN_LAYERS = 2
EPS = 1e-12
B = 2              # batch
S = 8              # seq len
BS = B * S

# TODO(synk): attention_mask / head_mask are None in this setup; an additive
# mask could be passed as one extra VMEM input and added to the scores.


def _layernorm(x, g, b, eps):
    mu = jnp.mean(x, axis=-1, keepdims=True)
    var = jnp.mean((x - mu) ** 2, axis=-1, keepdims=True)
    return (x - mu) * jax.lax.rsqrt(var + eps) * g + b


def _gelu_new(x):
    # ACT2FN["gelu_new"]: tanh approximation used by ALBERT.
    c = math.sqrt(2.0 / math.pi)
    return 0.5 * x * (1.0 + jnp.tanh(c * (x + 0.044715 * x * x * x)))


# ------------------------------------------------------------------
# Fused kernel: embedding mapping + NUM_HIDDEN_LAYERS shared ALBERT layers.
# Everything (activations + weights) lives in VMEM; no grid.
# ------------------------------------------------------------------
def albert_fused_kernel(x_ref, wemb_ref, bemb_ref,
                        wqkv_ref, bqkv_ref,
                        wd_ref, bd_ref, g1_ref, be1_ref,
                        wf_ref, bf_ref, wfo_ref, bfo_ref, g2_ref, be2_ref,
                        o_ref):
    x = x_ref[...].astype(jnp.float32)                      # (BS, E)

    # Weights loaded once (shared across the unrolled layer loop).
    wqkv = wqkv_ref[...]
    wd = wd_ref[...]
    wf = wf_ref[...]
    wfo = wfo_ref[...]

    # Hoist all per-layer broadcasts out of the unrolled loop (no CSE in JAX).
    bqkv = jnp.broadcast_to(bqkv_ref[...], (BS, 3 * H))
    bd = jnp.broadcast_to(bd_ref[...], (BS, H))
    g1 = jnp.broadcast_to(g1_ref[...], (BS, H))
    be1 = jnp.broadcast_to(be1_ref[...], (BS, H))
    bf = jnp.broadcast_to(bf_ref[...], (BS, I))
    bfo = jnp.broadcast_to(bfo_ref[...], (BS, H))
    g2 = jnp.broadcast_to(g2_ref[...], (BS, H))
    be2 = jnp.broadcast_to(be2_ref[...], (BS, H))

    # embedding_hidden_mapping_in: (BS, E) -> (BS, H)
    h = jnp.dot(x, wemb_ref[...], preferred_element_type=jnp.float32) + bemb_ref[...]

    scale = 1.0 / math.sqrt(HD)
    contract_last = (((1,), (1,)), ((), ()))                # q @ k^T w/o explicit .T

    # ALBERT shares one layer's parameters across all hidden layers
    # (num_hidden_groups=1, inner_group_num=1); unroll in-kernel.
    for _ in range(NUM_HIDDEN_LAYERS):
        # Packed Q/K/V projection: one MXU matmul with N = 3H = 96.
        qkv = jnp.dot(h, wqkv, preferred_element_type=jnp.float32) + bqkv
        q = qkv[:, 0:H]
        k = qkv[:, H:2 * H]
        v = qkv[:, 2 * H:3 * H]

        # Multi-head attention; static loops over (batch, head) — tiny tiles.
        ctx_rows = []
        for b in range(B):
            rows = slice(b * S, (b + 1) * S)
            qb, kb, vb = q[rows], k[rows], v[rows]
            head_ctx = []
            for hh in range(NH):
                cols = slice(hh * HD, (hh + 1) * HD)
                qh, kh, vh = qb[:, cols], kb[:, cols], vb[:, cols]
                s = jax.lax.dot_general(qh, kh, contract_last,
                                        preferred_element_type=jnp.float32) * scale
                s = s - jnp.max(s, axis=-1, keepdims=True)
                p = jnp.exp(s)
                p = p / jnp.sum(p, axis=-1, keepdims=True)   # softmax (dropout = id)
                head_ctx.append(jnp.dot(p, vh, preferred_element_type=jnp.float32))
            ctx_rows.append(jnp.concatenate(head_ctx, axis=-1))   # (S, H)
        ctx = jnp.concatenate(ctx_rows, axis=0)                   # (BS, H)

        # Attention output projection + residual + LayerNorm
        proj = jnp.dot(ctx, wd, preferred_element_type=jnp.float32) + bd
        attn_out = _layernorm(h + proj, g1, be1, EPS)

        # FFN: Linear -> gelu_new -> Linear, residual + LayerNorm
        ff = jnp.dot(attn_out, wf, preferred_element_type=jnp.float32) + bf
        ff = _gelu_new(ff)
        ffo = jnp.dot(ff, wfo, preferred_element_type=jnp.float32) + bfo
        h = _layernorm(ffo + attn_out, g2, be2, EPS)

    # NOTE: last dim H=32 < 128 -> masked stores; negligible at this size
    # (would pack to a lane-dense slab if the config scaled up).
    o_ref[...] = h.astype(o_ref.dtype)


# ------------------------------------------------------------------
# Wrapper: one pallas_call, whole arrays resident in VMEM (no grid).
# ------------------------------------------------------------------
@jax.jit
def albert_transformer(x, params):
    Bn, Sn, En = x.shape
    x_flat = x.reshape(Bn * Sn, En)
    out_flat = pl.pallas_call(
        albert_fused_kernel,
        out_shape=jax.ShapeDtypeStruct((Bn * Sn, H), x.dtype),
    )(x_flat,
      params["emb_w"], params["emb_b"],
      params["w_qkv"], params["b_qkv"],
      params["w_d"], params["b_d"], params["g1"], params["be1"],
      params["w_f"], params["b_f"], params["w_fo"], params["b_fo"],
      params["g2"], params["be2"])
    return out_flat.reshape(Bn, Sn, H)   # last_hidden_state


def init_params(key):
    def dense(k, fan_in, fan_out):
        kw, kb = jax.random.split(k)
        w = jax.random.normal(kw, (fan_in, fan_out), jnp.float32) * 0.02
        b = jax.random.normal(kb, (1, fan_out), jnp.float32) * 0.02
        return w, b

    keys = jax.random.split(key, 8)
    emb_w, emb_b = dense(keys[0], E, H)
    wq, bq = dense(keys[1], H, H)
    wk, bk = dense(keys[2], H, H)
    wv, bv = dense(keys[3], H, H)
    wd, bd = dense(keys[4], H, H)
    wf, bf = dense(keys[5], H, I)
    wfo, bfo = dense(keys[6], I, H)
    # Pack Q/K/V along the output dimension: (H, 3H) / (1, 3H).
    w_qkv = jnp.concatenate([wq, wk, wv], axis=1)
    b_qkv = jnp.concatenate([bq, bk, bv], axis=1)
    return dict(
        emb_w=emb_w, emb_b=emb_b,
        w_qkv=w_qkv, b_qkv=b_qkv,
        w_d=wd, b_d=bd,
        g1=jnp.ones((1, H), jnp.float32), be1=jnp.zeros((1, H), jnp.float32),
        w_f=wf, b_f=bf, w_fo=wfo, b_fo=bfo,
        g2=jnp.ones((1, H), jnp.float32), be2=jnp.zeros((1, H), jnp.float32),
    )


if __name__ == "__main__":
    key = jax.random.PRNGKey(0)
    k_params, k_x = jax.random.split(key)
    params = init_params(k_params)
    x = jax.random.normal(k_x, (B, S, E), jnp.float32)   # [batch, seq, embedding_size]

    out = albert_transformer(x, params)
    out = jax.block_until_ready(out)
    assert out.shape == (B, S, H)
    assert bool(jnp.all(jnp.isfinite(out)))
    print("KERNEL_OK")
</pallas_src>

<mosaic_0001>
module attributes {stable_mosaic.version = 11 : i64} {
  func.func @albert_fused_kernel(%arg0: memref<16x16xf32, #tpu.memory_space<vmem>>, %arg1: memref<16x32xf32, #tpu.memory_space<vmem>>, %arg2: memref<1x32xf32, #tpu.memory_space<vmem>>, %arg3: memref<32x96xf32, #tpu.memory_space<vmem>>, %arg4: memref<1x96xf32, #tpu.memory_space<vmem>>, %arg5: memref<32x32xf32, #tpu.memory_space<vmem>>, %arg6: memref<1x32xf32, #tpu.memory_space<vmem>>, %arg7: memref<1x32xf32, #tpu.memory_space<vmem>>, %arg8: memref<1x32xf32, #tpu.memory_space<vmem>>, %arg9: memref<32x64xf32, #tpu.memory_space<vmem>>, %arg10: memref<1x64xf32, #tpu.memory_space<vmem>>, %arg11: memref<64x32xf32, #tpu.memory_space<vmem>>, %arg12: memref<1x32xf32, #tpu.memory_space<vmem>>, %arg13: memref<1x32xf32, #tpu.memory_space<vmem>>, %arg14: memref<1x32xf32, #tpu.memory_space<vmem>>, %arg15: memref<16x32xf32, #tpu.memory_space<vmem>>) attributes {dimension_semantics = [], scalar_prefetch = 0 : i64, scratch_operands = 0 : i64, tpu.core_type = #tpu.core_type<tc>} {
    %c0 = arith.constant 0 : index
    %c0_0 = arith.constant 0 : index
    %0 = vector.load %arg0[%c0, %c0_0] : memref<16x16xf32, #tpu.memory_space<vmem>>, vector<16x16xf32>
    %c0_1 = arith.constant 0 : index
    %c0_2 = arith.constant 0 : index
    %1 = vector.load %arg3[%c0_1, %c0_2] : memref<32x96xf32, #tpu.memory_space<vmem>>, vector<32x96xf32>
    %c0_3 = arith.constant 0 : index
    %c0_4 = arith.constant 0 : index
    %2 = vector.load %arg5[%c0_3, %c0_4] : memref<32x32xf32, #tpu.memory_space<vmem>>, vector<32x32xf32>
    %c0_5 = arith.constant 0 : index
    %c0_6 = arith.constant 0 : index
    %3 = vector.load %arg9[%c0_5, %c0_6] : memref<32x64xf32, #tpu.memory_space<vmem>>, vector<32x64xf32>
    %c0_7 = arith.constant 0 : index
    %c0_8 = arith.constant 0 : index
    %4 = vector.load %arg11[%c0_7, %c0_8] : memref<64x32xf32, #tpu.memory_space<vmem>>, vector<64x32xf32>
    %c0_9 = arith.constant 0 : index
    %c0_10 = arith.constant 0 : index
    %5 = vector.load %arg4[%c0_9, %c0_10] : memref<1x96xf32, #tpu.memory_space<vmem>>, vector<1x96xf32>
    %6 = vector.shape_cast %5 : vector<1x96xf32> to vector<1x96xf32>
    %7 = vector.broadcast %6 : vector<1x96xf32> to vector<16x96xf32>
    %c0_11 = arith.constant 0 : index
    %c0_12 = arith.constant 0 : index
    %8 = vector.load %arg6[%c0_11, %c0_12] : memref<1x32xf32, #tpu.memory_space<vmem>>, vector<1x32xf32>
    %9 = vector.shape_cast %8 : vector<1x32xf32> to vector<1x32xf32>
    %10 = vector.broadcast %9 : vector<1x32xf32> to vector<16x32xf32>
    %c0_13 = arith.constant 0 : index
    %c0_14 = arith.constant 0 : index
    %11 = vector.load %arg7[%c0_13, %c0_14] : memref<1x32xf32, #tpu.memory_space<vmem>>, vector<1x32xf32>
    %12 = vector.shape_cast %11 : vector<1x32xf32> to vector<1x32xf32>
    %13 = vector.broadcast %12 : vector<1x32xf32> to vector<16x32xf32>
    %c0_15 = arith.constant 0 : index
    %c0_16 = arith.constant 0 : index
    %14 = vector.load %arg8[%c0_15, %c0_16] : memref<1x32xf32, #tpu.memory_space<vmem>>, vector<1x32xf32>
    %15 = vector.shape_cast %14 : vector<1x32xf32> to vector<1x32xf32>
    %16 = vector.broadcast %15 : vector<1x32xf32> to vector<16x32xf32>
    %c0_17 = arith.constant 0 : index
    %c0_18 = arith.constant 0 : index
    %17 = vector.load %arg10[%c0_17, %c0_18] : memref<1x64xf32, #tpu.memory_space<vmem>>, vector<1x64xf32>
    %18 = vector.shape_cast %17 : vector<1x64xf32> to vector<1x64xf32>
    %19 = vector.broadcast %18 : vector<1x64xf32> to vector<16x64xf32>
    %c0_19 = arith.constant 0 : index
    %c0_20 = arith.constant 0 : index
    %20 = vector.load %arg12[%c0_19, %c0_20] : memref<1x32xf32, #tpu.memory_space<vmem>>, vector<1x32xf32>
    %21 = vector.shape_cast %20 : vector<1x32xf32> to vector<1x32xf32>
    %22 = vector.broadcast %21 : vector<1x32xf32> to vector<16x32xf32>
    %c0_21 = arith.constant 0 : index
    %c0_22 = arith.constant 0 : index
    %23 = vector.load %arg13[%c0_21, %c0_22] : memref<1x32xf32, #tpu.memory_space<vmem>>, vector<1x32xf32>
    %24 = vector.shape_cast %23 : vector<1x32xf32> to vector<1x32xf32>
    %25 = vector.broadcast %24 : vector<1x32xf32> to vector<16x32xf32>
    %c0_23 = arith.constant 0 : index
    %c0_24 = arith.constant 0 : index
    %26 = vector.load %arg14[%c0_23, %c0_24] : memref<1x32xf32, #tpu.memory_space<vmem>>, vector<1x32xf32>
    %27 = vector.shape_cast %26 : vector<1x32xf32> to vector<1x32xf32>
    %28 = vector.broadcast %27 : vector<1x32xf32> to vector<16x32xf32>
    %c0_25 = arith.constant 0 : index
    %c0_26 = arith.constant 0 : index
    %29 = vector.load %arg1[%c0_25, %c0_26] : memref<16x32xf32, #tpu.memory_space<vmem>>, vector<16x32xf32>
    %cst = arith.constant dense<0.000000e+00> : vector<16x32xf32>
    %30 = tpu.matmul %0, %29, %cst {dimension_numbers = #tpu.dot_dimension_numbers<[1], [0], [0], [1], [0, 0, 1, 1], [], []>} : vector<16x16xf32>, vector<16x32xf32>, vector<16x32xf32> -> vector<16x32xf32>
    %c0_27 = arith.constant 0 : index
    %c0_28 = arith.constant 0 : index
    %31 = vector.load %arg2[%c0_27, %c0_28] : memref<1x32xf32, #tpu.memory_space<vmem>>, vector<1x32xf32>
    %32 = vector.broadcast %31 : vector<1x32xf32> to vector<16x32xf32>
    %33 = arith.addf %30, %32 : vector<16x32xf32>
    %cst_29 = arith.constant dense<0.000000e+00> : vector<16x96xf32>
    %34 = tpu.matmul %33, %1, %cst_29 {dimension_numbers = #tpu.dot_dimension_numbers<[1], [0], [0], [1], [0, 0, 1, 1], [], []>} : vector<16x32xf32>, vector<32x96xf32>, vector<16x96xf32> -> vector<16x96xf32>
    %35 = arith.addf %34, %7 : vector<16x96xf32>
    %36 = vector.extract_strided_slice %35 {offsets = [0, 0], sizes = [16, 32], strides = [1, 1]} : vector<16x96xf32> to vector<16x32xf32>
    %37 = vector.extract_strided_slice %35 {offsets = [0, 32], sizes = [16, 32], strides = [1, 1]} : vector<16x96xf32> to vector<16x32xf32>
    %38 = vector.extract_strided_slice %35 {offsets = [0, 64], sizes = [16, 32], strides = [1, 1]} : vector<16x96xf32> to vector<16x32xf32>
    %39 = vector.extract_strided_slice %36 {offsets = [0, 0], sizes = [8, 32], strides = [1, 1]} : vector<16x32xf32> to vector<8x32xf32>
    %40 = vector.extract_strided_slice %37 {offsets = [0, 0], sizes = [8, 32], strides = [1, 1]} : vector<16x32xf32> to vector<8x32xf32>
    %41 = vector.extract_strided_slice %38 {offsets = [0, 0], sizes = [8, 32], strides = [1, 1]} : vector<16x32xf32> to vector<8x32xf32>
    %42 = vector.extract_strided_slice %39 {offsets = [0, 0], sizes = [8, 8], strides = [1, 1]} : vector<8x32xf32> to vector<8x8xf32>
    %43 = vector.extract_strided_slice %40 {offsets = [0, 0], sizes = [8, 8], strides = [1, 1]} : vector<8x32xf32> to vector<8x8xf32>
    %44 = vector.extract_strided_slice %41 {offsets = [0, 0], sizes = [8, 8], strides = [1, 1]} : vector<8x32xf32> to vector<8x8xf32>
    %cst_30 = arith.constant dense<0.000000e+00> : vector<8x8xf32>
    %45 = tpu.matmul %42, %43, %cst_30 {dimension_numbers = #tpu.dot_dimension_numbers<[1], [1], [0], [0], [0, 0, 1, 0], [], []>} : vector<8x8xf32>, vector<8x8xf32>, vector<8x8xf32> -> vector<8x8xf32>
    %cst_31 = arith.constant 0.353553385 : f32
    %46 = vector.broadcast %cst_31 : f32 to vector<8x8xf32>
    %47 = arith.mulf %45, %46 : vector<8x8xf32>
    %cst_32 = arith.constant dense<0xFF800000> : vector<8xf32>
    %48 = vector.multi_reduction <maximumf>, %47, %cst_32 [1] : vector<8x8xf32> to vector<8xf32>
    %49 = vector.shape_cast %48 : vector<8xf32> to vector<8x1xf32>
    %50 = vector.broadcast %49 : vector<8x1xf32> to vector<8x8xf32>
    %51 = arith.subf %47, %50 : vector<8x8xf32>
    %52 = math.exp %51 : vector<8x8xf32>
    %cst_33 = arith.constant dense<0.000000e+00> : vector<8xf32>
    %53 = vector.multi_reduction <add>, %52, %cst_33 [1] : vector<8x8xf32> to vector<8xf32>
    %54 = vector.shape_cast %53 : vector<8xf32> to vector<8x1xf32>
    %55 = vector.broadcast %54 : vector<8x1xf32> to vector<8x8xf32>
    %56 = arith.divf %52, %55 : vector<8x8xf32>
    %cst_34 = arith.constant dense<0.000000e+00> : vector<8x8xf32>
    %57 = tpu.matmul %56, %44, %cst_34 {dimension_numbers = #tpu.dot_dimension_numbers<[1], [0], [0], [1], [0, 0, 1, 1], [], []>} : vector<8x8xf32>, vector<8x8xf32>, vector<8x8xf32> -> vector<8x8xf32>
    %58 = vector.extract_strided_slice %39 {offsets = [0, 8], sizes = [8, 8], strides = [1, 1]} : vector<8x32xf32> to vector<8x8xf32>
    %59 = vector.extract_strided_slice %40 {offsets = [0, 8], sizes = [8, 8], strides = [1, 1]} : vector<8x32xf32> to vector<8x8xf32>
    %60 = vector.extract_strided_slice %41 {offsets = [0, 8], sizes = [8, 8], strides = [1, 1]} : vector<8x32xf32> to vector<8x8xf32>
    %cst_35 = arith.constant dense<0.000000e+00> : vector<8x8xf32>
    %61 = tpu.matmul %58, %59, %cst_35 {dimension_numbers = #tpu.dot_dimension_numbers<[1], [1], [0], [0], [0, 0, 1, 0], [], []>} : vector<8x8xf32>, vector<8x8xf32>, vector<8x8xf32> -> vector<8x8xf32>
    %cst_36 = arith.constant 0.353553385 : f32
    %62 = vector.broadcast %cst_36 : f32 to vector<8x8xf32>
    %63 = arith.mulf %61, %62 : vector<8x8xf32>
    %cst_37 = arith.constant dense<0xFF800000> : vector<8xf32>
    %64 = vector.multi_reduction <maximumf>, %63, %cst_37 [1] : vector<8x8xf32> to vector<8xf32>
    %65 = vector.shape_cast %64 : vector<8xf32> to vector<8x1xf32>
    %66 = vector.broadcast %65 : vector<8x1xf32> to vector<8x8xf32>
    %67 = arith.subf %63, %66 : vector<8x8xf32>
    %68 = math.exp %67 : vector<8x8xf32>
    %cst_38 = arith.constant dense<0.000000e+00> : vector<8xf32>
    %69 = vector.multi_reduction <add>, %68, %cst_38 [1] : vector<8x8xf32> to vector<8xf32>
    %70 = vector.shape_cast %69 : vector<8xf32> to vector<8x1xf32>
    %71 = vector.broadcast %70 : vector<8x1xf32> to vector<8x8xf32>
    %72 = arith.divf %68, %71 : vector<8x8xf32>
    %cst_39 = arith.constant dense<0.000000e+00> : vector<8x8xf32>
    %73 = tpu.matmul %72, %60, %cst_39 {dimension_numbers = #tpu.dot_dimension_numbers<[1], [0], [0], [1], [0, 0, 1, 1], [], []>} : vector<8x8xf32>, vector<8x8xf32>, vector<8x8xf32> -> vector<8x8xf32>
    %74 = vector.extract_strided_slice %39 {offsets = [0, 16], sizes = [8, 8], strides = [1, 1]} : vector<8x32xf32> to vector<8x8xf32>
    %75 = vector.extract_strided_slice %40 {offsets = [0, 16], sizes = [8, 8], strides = [1, 1]} : vector<8x32xf32> to vector<8x8xf32>
    %76 = vector.extract_strided_slice %41 {offsets = [0, 16], sizes = [8, 8], strides = [1, 1]} : vector<8x32xf32> to vector<8x8xf32>
    %cst_40 = arith.constant dense<0.000000e+00> : vector<8x8xf32>
    %77 = tpu.matmul %74, %75, %cst_40 {dimension_numbers = #tpu.dot_dimension_numbers<[1], [1], [0], [0], [0, 0, 1, 0], [], []>} : vector<8x8xf32>, vector<8x8xf32>, vector<8x8xf32> -> vector<8x8xf32>
    %cst_41 = arith.constant 0.353553385 : f32
    %78 = vector.broadcast %cst_41 : f32 to vector<8x8xf32>
    %79 = arith.mulf %77, %78 : vector<8x8xf32>
    %cst_42 = arith.constant dense<0xFF800000> : vector<8xf32>
    %80 = vector.multi_reduction <maximumf>, %79, %cst_42 [1] : vector<8x8xf32> to vector<8xf32>
    %81 = vector.shape_cast %80 : vector<8xf32> to vector<8x1xf32>
    %82 = vector.broadcast %81 : vector<8x1xf32> to vector<8x8xf32>
    %83 = arith.subf %79, %82 : vector<8x8xf32>
    %84 = math.exp %83 : vector<8x8xf32>
    %cst_43 = arith.constant dense<0.000000e+00> : vector<8xf32>
    %85 = vector.multi_reduction <add>, %84, %cst_43 [1] : vector<8x8xf32> to vector<8xf32>
    %86 = vector.shape_cast %85 : vector<8xf32> to vector<8x1xf32>
    %87 = vector.broadcast %86 : vector<8x1xf32> to vector<8x8xf32>
    %88 = arith.divf %84, %87 : vector<8x8xf32>
    %cst_44 = arith.constant dense<0.000000e+00> : vector<8x8xf32>
    %89 = tpu.matmul %88, %76, %cst_44 {dimension_numbers = #tpu.dot_dimension_numbers<[1], [0], [0], [1], [0, 0, 1, 1], [], []>} : vector<8x8xf32>, vector<8x8xf32>, vector<8x8xf32> -> vector<8x8xf32>
    %90 = vector.extract_strided_slice %39 {offsets = [0, 24], sizes = [8, 8], strides = [1, 1]} : vector<8x32xf32> to vector<8x8xf32>
    %91 = vector.extract_strided_slice %40 {offsets = [0, 24], sizes = [8, 8], strides = [1, 1]} : vector<8x32xf32> to vector<8x8xf32>
    %92 = vector.extract_strided_slice %41 {offsets = [0, 24], sizes = [8, 8], strides = [1, 1]} : vector<8x32xf32> to vector<8x8xf32>
    %cst_45 = arith.constant dense<0.000000e+00> : vector<8x8xf32>
    %93 = tpu.matmul %90, %91, %cst_45 {dimension_numbers = #tpu.dot_dimension_numbers<[1], [1], [0], [0], [0, 0, 1, 0], [], []>} : vector<8x8xf32>, vector<8x8xf32>, vector<8x8xf32> -> vector<8x8xf32>
    %cst_46 = arith.constant 0.353553385 : f32
    %94 = vector.broadcast %cst_46 : f32 to vector<8x8xf32>
    %95 = arith.mulf %93, %94 : vector<8x8xf32>
    %cst_47 = arith.constant dense<0xFF800000> : vector<8xf32>
    %96 = vector.multi_reduction <maximumf>, %95, %cst_47 [1] : vector<8x8xf32> to vector<8xf32>
    %97 = vector.shape_cast %96 : vector<8xf32> to vector<8x1xf32>
    %98 = vector.broadcast %97 : vector<8x1xf32> to vector<8x8xf32>
    %99 = arith.subf %95, %98 : vector<8x8xf32>
    %100 = math.exp %99 : vector<8x8xf32>
    %cst_48 = arith.constant dense<0.000000e+00> : vector<8xf32>
    %101 = vector.multi_reduction <add>, %100, %cst_48 [1] : vector<8x8xf32> to vector<8xf32>
    %102 = vector.shape_cast %101 : vector<8xf32> to vector<8x1xf32>
    %103 = vector.broadcast %102 : vector<8x1xf32> to vector<8x8xf32>
    %104 = arith.divf %100, %103 : vector<8x8xf32>
    %cst_49 = arith.constant dense<0.000000e+00> : vector<8x8xf32>
    %105 = tpu.matmul %104, %92, %cst_49 {dimension_numbers = #tpu.dot_dimension_numbers<[1], [0], [0], [1], [0, 0, 1, 1], [], []>} : vector<8x8xf32>, vector<8x8xf32>, vector<8x8xf32> -> vector<8x8xf32>
    %106 = tpu.concatenate %57, %73, %89, %105 in 1 : vector<8x8xf32>, vector<8x8xf32>, vector<8x8xf32>, vector<8x8xf32> -> vector<8x32xf32>
    %107 = vector.extract_strided_slice %36 {offsets = [8, 0], sizes = [8, 32], strides = [1, 1]} : vector<16x32xf32> to vector<8x32xf32>
    %108 = vector.extract_strided_slice %37 {offsets = [8, 0], sizes = [8, 32], strides = [1, 1]} : vector<16x32xf32> to vector<8x32xf32>
    %109 = vector.extract_strided_slice %38 {offsets = [8, 0], sizes = [8, 32], strides = [1, 1]} : vector<16x32xf32> to vector<8x32xf32>
    %110 = vector.extract_strided_slice %107 {offsets = [0, 0], sizes = [8, 8], strides = [1, 1]} : vector<8x32xf32> to vector<8x8xf32>
    %111 = vector.extract_strided_slice %108 {offsets = [0, 0], sizes = [8, 8], strides = [1, 1]} : vector<8x32xf32> to vector<8x8xf32>
    %112 = vector.extract_strided_slice %109 {offsets = [0, 0], sizes = [8, 8], strides = [1, 1]} : vector<8x32xf32> to vector<8x8xf32>
    %cst_50 = arith.constant dense<0.000000e+00> : vector<8x8xf32>
    %113 = tpu.matmul %110, %111, %cst_50 {dimension_numbers = #tpu.dot_dimension_numbers<[1], [1], [0], [0], [0, 0, 1, 0], [], []>} : vector<8x8xf32>, vector<8x8xf32>, vector<8x8xf32> -> vector<8x8xf32>
    %cst_51 = arith.constant 0.353553385 : f32
    %114 = vector.broadcast %cst_51 : f32 to vector<8x8xf32>
    %115 = arith.mulf %113, %114 : vector<8x8xf32>
    %cst_52 = arith.constant dense<0xFF800000> : vector<8xf32>
    %116 = vector.multi_reduction <maximumf>, %115, %cst_52 [1] : vector<8x8xf32> to vector<8xf32>
    %117 = vector.shape_cast %116 : vector<8xf32> to vector<8x1xf32>
    %118 = vector.broadcast %117 : vector<8x1xf32> to vector<8x8xf32>
    %119 = arith.subf %115, %118 : vector<8x8xf32>
    %120 = math.exp %119 : vector<8x8xf32>
    %cst_53 = arith.constant dense<0.000000e+00> : vector<8xf32>
    %121 = vector.multi_reduction <add>, %120, %cst_53 [1] : vector<8x8xf32> to vector<8xf32>
    %122 = vector.shape_cast %121 : vector<8xf32> to vector<8x1xf32>
    %123 = vector.broadcast %122 : vector<8x1xf32> to vector<8x8xf32>
    %124 = arith.divf %120, %123 : vector<8x8xf32>
    %cst_54 = arith.constant dense<0.000000e+00> : vector<8x8xf32>
    %125 = tpu.matmul %124, %112, %cst_54 {dimension_numbers = #tpu.dot_dimension_numbers<[1], [0], [0], [1], [0, 0, 1, 1], [], []>} : vector<8x8xf32>, vector<8x8xf32>, vector<8x8xf32> -> vector<8x8xf32>
    %126 = vector.extract_strided_slice %107 {offsets = [0, 8], sizes = [8, 8], strides = [1, 1]} : vector<8x32xf32> to vector<8x8xf32>
    %127 = vector.extract_strided_slice %108 {offsets = [0, 8], sizes = [8, 8], strides = [1, 1]} : vector<8x32xf32> to vector<8x8xf32>
    %128 = vector.extract_strided_slice %109 {offsets = [0, 8], sizes = [8, 8], strides = [1, 1]} : vector<8x32xf32> to vector<8x8xf32>
    %cst_55 = arith.constant dense<0.000000e+00> : vector<8x8xf32>
    %129 = tpu.matmul %126, %127, %cst_55 {dimension_numbers = #tpu.dot_dimension_numbers<[1], [1], [0], [0], [0, 0, 1, 0], [], []>} : vector<8x8xf32>, vector<8x8xf32>, vector<8x8xf32> -> vector<8x8xf32>
    %cst_56 = arith.constant 0.353553385 : f32
    %130 = vector.broadcast %cst_56 : f32 to vector<8x8xf32>
    %131 = arith.mulf %129, %130 : vector<8x8xf32>
    %cst_57 = arith.constant dense<0xFF800000> : vector<8xf32>
    %132 = vector.multi_reduction <maximumf>, %131, %cst_57 [1] : vector<8x8xf32> to vector<8xf32>
    %133 = vector.shape_cast %132 : vector<8xf32> to vector<8x1xf32>
    %134 = vector.broadcast %133 : vector<8x1xf32> to vector<8x8xf32>
    %135 = arith.subf %131, %134 : vector<8x8xf32>
    %136 = math.exp %135 : vector<8x8xf32>
    %cst_58 = arith.constant dense<0.000000e+00> : vector<8xf32>
    %137 = vector.multi_reduction <add>, %136, %cst_58 [1] : vector<8x8xf32> to vector<8xf32>
    %138 = vector.shape_cast %137 : vector<8xf32> to vector<8x1xf32>
    %139 = vector.broadcast %138 : vector<8x1xf32> to vector<8x8xf32>
    %140 = arith.divf %136, %139 : vector<8x8xf32>
    %cst_59 = arith.constant dense<0.000000e+00> : vector<8x8xf32>
    %141 = tpu.matmul %140, %128, %cst_59 {dimension_numbers = #tpu.dot_dimension_numbers<[1], [0], [0], [1], [0, 0, 1, 1], [], []>} : vector<8x8xf32>, vector<8x8xf32>, vector<8x8xf32> -> vector<8x8xf32>
    %142 = vector.extract_strided_slice %107 {offsets = [0, 16], sizes = [8, 8], strides = [1, 1]} : vector<8x32xf32> to vector<8x8xf32>
    %143 = vector.extract_strided_slice %108 {offsets = [0, 16], sizes = [8, 8], strides = [1, 1]} : vector<8x32xf32> to vector<8x8xf32>
    %144 = vector.extract_strided_slice %109 {offsets = [0, 16], sizes = [8, 8], strides = [1, 1]} : vector<8x32xf32> to vector<8x8xf32>
    %cst_60 = arith.constant dense<0.000000e+00> : vector<8x8xf32>
    %145 = tpu.matmul %142, %143, %cst_60 {dimension_numbers = #tpu.dot_dimension_numbers<[1], [1], [0], [0], [0, 0, 1, 0], [], []>} : vector<8x8xf32>, vector<8x8xf32>, vector<8x8xf32> -> vector<8x8xf32>
    %cst_61 = arith.constant 0.353553385 : f32
    %146 = vector.broadcast %cst_61 : f32 to vector<8x8xf32>
    %147 = arith.mulf %145, %146 : vector<8x8xf32>
    %cst_62 = arith.constant dense<0xFF800000> : vector<8xf32>
    %148 = vector.multi_reduction <maximumf>, %147, %cst_62 [1] : vector<8x8xf32> to vector<8xf32>
    %149 = vector.shape_cast %148 : vector<8xf32> to vector<8x1xf32>
    %150 = vector.broadcast %149 : vector<8x1xf32> to vector<8x8xf32>
    %151 = arith.subf %147, %150 : vector<8x8xf32>
    %152 = math.exp %151 : vector<8x8xf32>
    %cst_63 = arith.constant dense<0.000000e+00> : vector<8xf32>
    %153 = vector.multi_reduction <add>, %152, %cst_63 [1] : vector<8x8xf32> to vector<8xf32>
    %154 = vector.shape_cast %153 : vector<8xf32> to vector<8x1xf32>
    %155 = vector.broadcast %154 : vector<8x1xf32> to vector<8x8xf32>
    %156 = arith.divf %152, %155 : vector<8x8xf32>
    %cst_64 = arith.constant dense<0.000000e+00> : vector<8x8xf32>
    %157 = tpu.matmul %156, %144, %cst_64 {dimension_numbers = #tpu.dot_dimension_numbers<[1], [0], [0], [1], [0, 0, 1, 1], [], []>} : vector<8x8xf32>, vector<8x8xf32>, vector<8x8xf32> -> vector<8x8xf32>
    %158 = vector.extract_strided_slice %107 {offsets = [0, 24], sizes = [8, 8], strides = [1, 1]} : vector<8x32xf32> to vector<8x8xf32>
    %159 = vector.extract_strided_slice %108 {offsets = [0, 24], sizes = [8, 8], strides = [1, 1]} : vector<8x32xf32> to vector<8x8xf32>
    %160 = vector.extract_strided_slice %109 {offsets = [0, 24], sizes = [8, 8], strides = [1, 1]} : vector<8x32xf32> to vector<8x8xf32>
    %cst_65 = arith.constant dense<0.000000e+00> : vector<8x8xf32>
    %161 = tpu.matmul %158, %159, %cst_65 {dimension_numbers = #tpu.dot_dimension_numbers<[1], [1], [0], [0], [0, 0, 1, 0], [], []>} : vector<8x8xf32>, vector<8x8xf32>, vector<8x8xf32> -> vector<8x8xf32>
    %cst_66 = arith.constant 0.353553385 : f32
    %162 = vector.broadcast %cst_66 : f32 to vector<8x8xf32>
    %163 = arith.mulf %161, %162 : vector<8x8xf32>
    %cst_67 = arith.constant dense<0xFF800000> : vector<8xf32>
    %164 = vector.multi_reduction <maximumf>, %163, %cst_67 [1] : vector<8x8xf32> to vector<8xf32>
    %165 = vector.shape_cast %164 : vector<8xf32> to vector<8x1xf32>
    %166 = vector.broadcast %165 : vector<8x1xf32> to vector<8x8xf32>
    %167 = arith.subf %163, %166 : vector<8x8xf32>
    %168 = math.exp %167 : vector<8x8xf32>
    %cst_68 = arith.constant dense<0.000000e+00> : vector<8xf32>
    %169 = vector.multi_reduction <add>, %168, %cst_68 [1] : vector<8x8xf32> to vector<8xf32>
    %170 = vector.shape_cast %169 : vector<8xf32> to vector<8x1xf32>
    %171 = vector.broadcast %170 : vector<8x1xf32> to vector<8x8xf32>
    %172 = arith.divf %168, %171 : vector<8x8xf32>
    %cst_69 = arith.constant dense<0.000000e+00> : vector<8x8xf32>
    %173 = tpu.matmul %172, %160, %cst_69 {dimension_numbers = #tpu.dot_dimension_numbers<[1], [0], [0], [1], [0, 0, 1, 1], [], []>} : vector<8x8xf32>, vector<8x8xf32>, vector<8x8xf32> -> vector<8x8xf32>
    %174 = tpu.concatenate %125, %141, %157, %173 in 1 : vector<8x8xf32>, vector<8x8xf32>, vector<8x8xf32>, vector<8x8xf32> -> vector<8x32xf32>
    %175 = tpu.concatenate %106, %174 in 0 : vector<8x32xf32>, vector<8x32xf32> -> vector<16x32xf32>
    %cst_70 = arith.constant dense<0.000000e+00> : vector<16x32xf32>
    %176 = tpu.matmul %175, %2, %cst_70 {dimension_numbers = #tpu.dot_dimension_numbers<[1], [0], [0], [1], [0, 0, 1, 1], [], []>} : vector<16x32xf32>, vector<32x32xf32>, vector<16x32xf32> -> vector<16x32xf32>
    %177 = arith.addf %176, %10 : vector<16x32xf32>
    %178 = arith.addf %33, %177 : vector<16x32xf32>
    %cst_71 = arith.constant dense<0.000000e+00> : vector<16xf32>
    %179 = vector.multi_reduction <add>, %178, %cst_71 [1] : vector<16x32xf32> to vector<16xf32>
    %180 = vector.shape_cast %179 : vector<16xf32> to vector<16x1xf32>
    %cst_72 = arith.constant 3.200000e+01 : f32
    %181 = vector.broadcast %cst_72 : f32 to vector<16x1xf32>
    %182 = arith.divf %180, %181 : vector<16x1xf32>
    %183 = vector.broadcast %182 : vector<16x1xf32> to vector<16x32xf32>
    %184 = arith.subf %178, %183 : vector<16x32xf32>
    %185 = arith.mulf %184, %184 : vector<16x32xf32>
    %cst_73 = arith.constant dense<0.000000e+00> : vector<16xf32>
    %186 = vector.multi_reduction <add>, %185, %cst_73 [1] : vector<16x32xf32> to vector<16xf32>
    %187 = vector.shape_cast %186 : vector<16xf32> to vector<16x1xf32>
    %cst_74 = arith.constant 3.200000e+01 : f32
    %188 = vector.broadcast %cst_74 : f32 to vector<16x1xf32>
    %189 = arith.divf %187, %188 : vector<16x1xf32>
    %190 = vector.broadcast %182 : vector<16x1xf32> to vector<16x32xf32>
    %191 = arith.subf %178, %190 : vector<16x32xf32>
    %cst_75 = arith.constant 9.99999996E-13 : f32
    %192 = vector.broadcast %cst_75 : f32 to vector<16x1xf32>
    %193 = arith.addf %189, %192 : vector<16x1xf32>
    %194 = math.rsqrt %193 : vector<16x1xf32>
    %195 = vector.broadcast %194 : vector<16x1xf32> to vector<16x32xf32>
    %196 = arith.mulf %191, %195 : vector<16x32xf32>
    %197 = arith.mulf %196, %13 : vector<16x32xf32>
    %198 = arith.addf %197, %16 : vector<16x32xf32>
    %cst_76 = arith.constant dense<0.000000e+00> : vector<16x64xf32>
    %199 = tpu.matmul %198, %3, %cst_76 {dimension_numbers = #tpu.dot_dimension_numbers<[1], [0], [0], [1], [0, 0, 1, 1], [], []>} : vector<16x32xf32>, vector<32x64xf32>, vector<16x64xf32> -> vector<16x64xf32>
    %200 = arith.addf %199, %19 : vector<16x64xf32>
    %cst_77 = arith.constant 5.000000e-01 : f32
    %201 = vector.broadcast %cst_77 : f32 to vector<16x64xf32>
    %202 = arith.mulf %201, %200 : vector<16x64xf32>
    %cst_78 = arith.constant 4.471500e-02 : f32
    %203 = vector.broadcast %cst_78 : f32 to vector<16x64xf32>
    %204 = arith.mulf %203, %200 : vector<16x64xf32>
    %205 = arith.mulf %204, %200 : vector<16x64xf32>
    %206 = arith.mulf %205, %200 : vector<16x64xf32>
    %207 = arith.addf %200, %206 : vector<16x64xf32>
    %cst_79 = arith.constant 0.797884583 : f32
    %208 = vector.broadcast %cst_79 : f32 to vector<16x64xf32>
    %209 = arith.mulf %208, %207 : vector<16x64xf32>
    %210 = math.tanh %209 : vector<16x64xf32>
    %cst_80 = arith.constant 1.000000e+00 : f32
    %211 = vector.broadcast %cst_80 : f32 to vector<16x64xf32>
    %212 = arith.addf %211, %210 : vector<16x64xf32>
    %213 = arith.mulf %202, %212 : vector<16x64xf32>
    %cst_81 = arith.constant dense<0.000000e+00> : vector<16x32xf32>
    %214 = tpu.matmul %213, %4, %cst_81 {dimension_numbers = #tpu.dot_dimension_numbers<[1], [0], [0], [1], [0, 0, 1, 1], [], []>} : vector<16x64xf32>, vector<64x32xf32>, vector<16x32xf32> -> vector<16x32xf32>
    %215 = arith.addf %214, %22 : vector<16x32xf32>
    %216 = arith.addf %215, %198 : vector<16x32xf32>
    %cst_82 = arith.constant dense<0.000000e+00> : vector<16xf32>
    %217 = vector.multi_reduction <add>, %216, %cst_82 [1] : vector<16x32xf32> to vector<16xf32>
    %218 = vector.shape_cast %217 : vector<16xf32> to vector<16x1xf32>
    %cst_83 = arith.constant 3.200000e+01 : f32
    %219 = vector.broadcast %cst_83 : f32 to vector<16x1xf32>
    %220 = arith.divf %218, %219 : vector<16x1xf32>
    %221 = vector.broadcast %220 : vector<16x1xf32> to vector<16x32xf32>
    %222 = arith.subf %216, %221 : vector<16x32xf32>
    %223 = arith.mulf %222, %222 : vector<16x32xf32>
    %cst_84 = arith.constant dense<0.000000e+00> : vector<16xf32>
    %224 = vector.multi_reduction <add>, %223, %cst_84 [1] : vector<16x32xf32> to vector<16xf32>
    %225 = vector.shape_cast %224 : vector<16xf32> to vector<16x1xf32>
    %cst_85 = arith.constant 3.200000e+01 : f32
    %226 = vector.broadcast %cst_85 : f32 to vector<16x1xf32>
    %227 = arith.divf %225, %226 : vector<16x1xf32>
    %228 = vector.broadcast %220 : vector<16x1xf32> to vector<16x32xf32>
    %229 = arith.subf %216, %228 : vector<16x32xf32>
    %cst_86 = arith.constant 9.99999996E-13 : f32
    %230 = vector.broadcast %cst_86 : f32 to vector<16x1xf32>
    %231 = arith.addf %227, %230 : vector<16x1xf32>
    %232 = math.rsqrt %231 : vector<16x1xf32>
    %233 = vector.broadcast %232 : vector<16x1xf32> to vector<16x32xf32>
    %234 = arith.mulf %229, %233 : vector<16x32xf32>
    %235 = arith.mulf %234, %25 : vector<16x32xf32>
    %236 = arith.addf %235, %28 : vector<16x32xf32>
    %cst_87 = arith.constant dense<0.000000e+00> : vector<16x96xf32>
    %237 = tpu.matmul %236, %1, %cst_87 {dimension_numbers = #tpu.dot_dimension_numbers<[1], [0], [0], [1], [0, 0, 1, 1], [], []>} : vector<16x32xf32>, vector<32x96xf32>, vector<16x96xf32> -> vector<16x96xf32>
    %238 = arith.addf %237, %7 : vector<16x96xf32>
    %239 = vector.extract_strided_slice %238 {offsets = [0, 0], sizes = [16, 32], strides = [1, 1]} : vector<16x96xf32> to vector<16x32xf32>
    %240 = vector.extract_strided_slice %238 {offsets = [0, 32], sizes = [16, 32], strides = [1, 1]} : vector<16x96xf32> to vector<16x32xf32>
    %241 = vector.extract_strided_slice %238 {offsets = [0, 64], sizes = [16, 32], strides = [1, 1]} : vector<16x96xf32> to vector<16x32xf32>
    %242 = vector.extract_strided_slice %239 {offsets = [0, 0], sizes = [8, 32], strides = [1, 1]} : vector<16x32xf32> to vector<8x32xf32>
    %243 = vector.extract_strided_slice %240 {offsets = [0, 0], sizes = [8, 32], strides = [1, 1]} : vector<16x32xf32> to vector<8x32xf32>
    %244 = vector.extract_strided_slice %241 {offsets = [0, 0], sizes = [8, 32], strides = [1, 1]} : vector<16x32xf32> to vector<8x32xf32>
    %245 = vector.extract_strided_slice %242 {offsets = [0, 0], sizes = [8, 8], strides = [1, 1]} : vector<8x32xf32> to vector<8x8xf32>
    %246 = vector.extract_strided_slice %243 {offsets = [0, 0], sizes = [8, 8], strides = [1, 1]} : vector<8x32xf32> to vector<8x8xf32>
    %247 = vector.extract_strided_slice %244 {offsets = [0, 0], sizes = [8, 8], strides = [1, 1]} : vector<8x32xf32> to vector<8x8xf32>
    %cst_88 = arith.constant dense<0.000000e+00> : vector<8x8xf32>
    %248 = tpu.matmul %245, %246, %cst_88 {dimension_numbers = #tpu.dot_dimension_numbers<[1], [1], [0], [0], [0, 0, 1, 0], [], []>} : vector<8x8xf32>, vector<8x8xf32>, vector<8x8xf32> -> vector<8x8xf32>
    %cst_89 = arith.constant 0.353553385 : f32
    %249 = vector.broadcast %cst_89 : f32 to vector<8x8xf32>
    %250 = arith.mulf %248, %249 : vector<8x8xf32>
    %cst_90 = arith.constant dense<0xFF800000> : vector<8xf32>
    %251 = vector.multi_reduction <maximumf>, %250, %cst_90 [1] : vector<8x8xf32> to vector<8xf32>
    %252 = vector.shape_cast %251 : vector<8xf32> to vector<8x1xf32>
    %253 = vector.broadcast %252 : vector<8x1xf32> to vector<8x8xf32>
    %254 = arith.subf %250, %253 : vector<8x8xf32>
    %255 = math.exp %254 : vector<8x8xf32>
    %cst_91 = arith.constant dense<0.000000e+00> : vector<8xf32>
    %256 = vector.multi_reduction <add>, %255, %cst_91 [1] : vector<8x8xf32> to vector<8xf32>
    %257 = vector.shape_cast %256 : vector<8xf32> to vector<8x1xf32>
    %258 = vector.broadcast %257 : vector<8x1xf32> to vector<8x8xf32>
    %259 = arith.divf %255, %258 : vector<8x8xf32>
    %cst_92 = arith.constant dense<0.000000e+00> : vector<8x8xf32>
    %260 = tpu.matmul %259, %247, %cst_92 {dimension_numbers = #tpu.dot_dimension_numbers<[1], [0], [0], [1], [0, 0, 1, 1], [], []>} : vector<8x8xf32>, vector<8x8xf32>, vector<8x8xf32> -> vector<8x8xf32>
    %261 = vector.extract_strided_slice %242 {offsets = [0, 8], sizes = [8, 8], strides = [1, 1]} : vector<8x32xf32> to vector<8x8xf32>
    %262 = vector.extract_strided_slice %243 {offsets = [0, 8], sizes = [8, 8], strides = [1, 1]} : vector<8x32xf32> to vector<8x8xf32>
    %263 = vector.extract_strided_slice %244 {offsets = [0, 8], sizes = [8, 8], strides = [1, 1]} : vector<8x32xf32> to vector<8x8xf32>
    %cst_93 = arith.constant dense<0.000000e+00> : vector<8x8xf32>
    %264 = tpu.matmul %261, %262, %cst_93 {dimension_numbers = #tpu.dot_dimension_numbers<[1], [1], [0], [0], [0, 0, 1, 0], [], []>} : vector<8x8xf32>, vector<8x8xf32>, vector<8x8xf32> -> vector<8x8xf32>
    %cst_94 = arith.constant 0.353553385 : f32
    %265 = vector.broadcast %cst_94 : f32 to vector<8x8xf32>
    %266 = arith.mulf %264, %265 : vector<8x8xf32>
    %cst_95 = arith.constant dense<0xFF800000> : vector<8xf32>
    %267 = vector.multi_reduction <maximumf>, %266, %cst_95 [1] : vector<8x8xf32> to vector<8xf32>
    %268 = vector.shape_cast %267 : vector<8xf32> to vector<8x1xf32>
    %269 = vector.broadcast %268 : vector<8x1xf32> to vector<8x8xf32>
    %270 = arith.subf %266, %269 : vector<8x8xf32>
    %271 = math.exp %270 : vector<8x8xf32>
    %cst_96 = arith.constant dense<0.000000e+00> : vector<8xf32>
    %272 = vector.multi_reduction <add>, %271, %cst_96 [1] : vector<8x8xf32> to vector<8xf32>
    %273 = vector.shape_cast %272 : vector<8xf32> to vector<8x1xf32>
    %274 = vector.broadcast %273 : vector<8x1xf32> to vector<8x8xf32>
    %275 = arith.divf %271, %274 : vector<8x8xf32>
    %cst_97 = arith.constant dense<0.000000e+00> : vector<8x8xf32>
    %276 = tpu.matmul %275, %263, %cst_97 {dimension_numbers = #tpu.dot_dimension_numbers<[1], [0], [0], [1], [0, 0, 1, 1], [], []>} : vector<8x8xf32>, vector<8x8xf32>, vector<8x8xf32> -> vector<8x8xf32>
    %277 = vector.extract_strided_slice %242 {offsets = [0, 16], sizes = [8, 8], strides = [1, 1]} : vector<8x32xf32> to vector<8x8xf32>
    %278 = vector.extract_strided_slice %243 {offsets = [0, 16], sizes = [8, 8], strides = [1, 1]} : vector<8x32xf32> to vector<8x8xf32>
    %279 = vector.extract_strided_slice %244 {offsets = [0, 16], sizes = [8, 8], strides = [1, 1]} : vector<8x32xf32> to vector<8x8xf32>
    %cst_98 = arith.constant dense<0.000000e+00> : vector<8x8xf32>
    %280 = tpu.matmul %277, %278, %cst_98 {dimension_numbers = #tpu.dot_dimension_numbers<[1], [1], [0], [0], [0, 0, 1, 0], [], []>} : vector<8x8xf32>, vector<8x8xf32>, vector<8x8xf32> -> vector<8x8xf32>
    %cst_99 = arith.constant 0.353553385 : f32
    %281 = vector.broadcast %cst_99 : f32 to vector<8x8xf32>
    %282 = arith.mulf %280, %281 : vector<8x8xf32>
    %cst_100 = arith.constant dense<0xFF800000> : vector<8xf32>
    %283 = vector.multi_reduction <maximumf>, %282, %cst_100 [1] : vector<8x8xf32> to vector<8xf32>
    %284 = vector.shape_cast %283 : vector<8xf32> to vector<8x1xf32>
    %285 = vector.broadcast %284 : vector<8x1xf32> to vector<8x8xf32>
    %286 = arith.subf %282, %285 : vector<8x8xf32>
    %287 = math.exp %286 : vector<8x8xf32>
    %cst_101 = arith.constant dense<0.000000e+00> : vector<8xf32>
    %288 = vector.multi_reduction <add>, %287, %cst_101 [1] : vector<8x8xf32> to vector<8xf32>
    %289 = vector.shape_cast %288 : vector<8xf32> to vector<8x1xf32>
    %290 = vector.broadcast %289 : vector<8x1xf32> to vector<8x8xf32>
    %291 = arith.divf %287, %290 : vector<8x8xf32>
    %cst_102 = arith.constant dense<0.000000e+00> : vector<8x8xf32>
    %292 = tpu.matmul %291, %279, %cst_102 {dimension_numbers = #tpu.dot_dimension_numbers<[1], [0], [0], [1], [0, 0, 1, 1], [], []>} : vector<8x8xf32>, vector<8x8xf32>, vector<8x8xf32> -> vector<8x8xf32>
    %293 = vector.extract_strided_slice %242 {offsets = [0, 24], sizes = [8, 8], strides = [1, 1]} : vector<8x32xf32> to vector<8x8xf32>
    %294 = vector.extract_strided_slice %243 {offsets = [0, 24], sizes = [8, 8], strides = [1, 1]} : vector<8x32xf32> to vector<8x8xf32>
    %295 = vector.extract_strided_slice %244 {offsets = [0, 24], sizes = [8, 8], strides = [1, 1]} : vector<8x32xf32> to vector<8x8xf32>
    %cst_103 = arith.constant dense<0.000000e+00> : vector<8x8xf32>
    %296 = tpu.matmul %293, %294, %cst_103 {dimension_numbers = #tpu.dot_dimension_numbers<[1], [1], [0], [0], [0, 0, 1, 0], [], []>} : vector<8x8xf32>, vector<8x8xf32>, vector<8x8xf32> -> vector<8x8xf32>
    %cst_104 = arith.constant 0.353553385 : f32
    %297 = vector.broadcast %cst_104 : f32 to vector<8x8xf32>
    %298 = arith.mulf %296, %297 : vector<8x8xf32>
    %cst_105 = arith.constant dense<0xFF800000> : vector<8xf32>
    %299 = vector.multi_reduction <maximumf>, %298, %cst_105 [1] : vector<8x8xf32> to vector<8xf32>
    %300 = vector.shape_cast %299 : vector<8xf32> to vector<8x1xf32>
    %301 = vector.broadcast %300 : vector<8x1xf32> to vector<8x8xf32>
    %302 = arith.subf %298, %301 : vector<8x8xf32>
    %303 = math.exp %302 : vector<8x8xf32>
    %cst_106 = arith.constant dense<0.000000e+00> : vector<8xf32>
    %304 = vector.multi_reduction <add>, %303, %cst_106 [1] : vector<8x8xf32> to vector<8xf32>
    %305 = vector.shape_cast %304 : vector<8xf32> to vector<8x1xf32>
    %306 = vector.broadcast %305 : vector<8x1xf32> to vector<8x8xf32>
    %307 = arith.divf %303, %306 : vector<8x8xf32>
    %cst_107 = arith.constant dense<0.000000e+00> : vector<8x8xf32>
    %308 = tpu.matmul %307, %295, %cst_107 {dimension_numbers = #tpu.dot_dimension_numbers<[1], [0], [0], [1], [0, 0, 1, 1], [], []>} : vector<8x8xf32>, vector<8x8xf32>, vector<8x8xf32> -> vector<8x8xf32>
    %309 = tpu.concatenate %260, %276, %292, %308 in 1 : vector<8x8xf32>, vector<8x8xf32>, vector<8x8xf32>, vector<8x8xf32> -> vector<8x32xf32>
    %310 = vector.extract_strided_slice %239 {offsets = [8, 0], sizes = [8, 32], strides = [1, 1]} : vector<16x32xf32> to vector<8x32xf32>
    %311 = vector.extract_strided_slice %240 {offsets = [8, 0], sizes = [8, 32], strides = [1, 1]} : vector<16x32xf32> to vector<8x32xf32>
    %312 = vector.extract_strided_slice %241 {offsets = [8, 0], sizes = [8, 32], strides = [1, 1]} : vector<16x32xf32> to vector<8x32xf32>
    %313 = vector.extract_strided_slice %310 {offsets = [0, 0], sizes = [8, 8], strides = [1, 1]} : vector<8x32xf32> to vector<8x8xf32>
    %314 = vector.extract_strided_slice %311 {offsets = [0, 0], sizes = [8, 8], strides = [1, 1]} : vector<8x32xf32> to vector<8x8xf32>
    %315 = vector.extract_strided_slice %312 {offsets = [0, 0], sizes = [8, 8], strides = [1, 1]} : vector<8x32xf32> to vector<8x8xf32>
    %cst_108 = arith.constant dense<0.000000e+00> : vector<8x8xf32>
    %316 = tpu.matmul %313, %314, %cst_108 {dimension_numbers = #tpu.dot_dimension_numbers<[1], [1], [0], [0], [0, 0, 1, 0], [], []>} : vector<8x8xf32>, vector<8x8xf32>, vector<8x8xf32> -> vector<8x8xf32>
    %cst_109 = arith.constant 0.353553385 : f32
    %317 = vector.broadcast %cst_109 : f32 to vector<8x8xf32>
    %318 = arith.mulf %316, %317 : vector<8x8xf32>
    %cst_110 = arith.constant dense<0xFF800000> : vector<8xf32>
    %319 = vector.multi_reduction <maximumf>, %318, %cst_110 [1] : vector<8x8xf32> to vector<8xf32>
    %320 = vector.shape_cast %319 : vector<8xf32> to vector<8x1xf32>
    %321 = vector.broadcast %320 : vector<8x1xf32> to vector<8x8xf32>
    %322 = arith.subf %318, %321 : vector<8x8xf32>
    %323 = math.exp %322 : vector<8x8xf32>
    %cst_111 = arith.constant dense<0.000000e+00> : vector<8xf32>
    %324 = vector.multi_reduction <add>, %323, %cst_111 [1] : vector<8x8xf32> to vector<8xf32>
    %325 = vector.shape_cast %324 : vector<8xf32> to vector<8x1xf32>
    %326 = vector.broadcast %325 : vector<8x1xf32> to vector<8x8xf32>
    %327 = arith.divf %323, %326 : vector<8x8xf32>
    %cst_112 = arith.constant dense<0.000000e+00> : vector<8x8xf32>
    %328 = tpu.matmul %327, %315, %cst_112 {dimension_numbers = #tpu.dot_dimension_numbers<[1], [0], [0], [1], [0, 0, 1, 1], [], []>} : vector<8x8xf32>, vector<8x8xf32>, vector<8x8xf32> -> vector<8x8xf32>
    %329 = vector.extract_strided_slice %310 {offsets = [0, 8], sizes = [8, 8], strides = [1, 1]} : vector<8x32xf32> to vector<8x8xf32>
    %330 = vector.extract_strided_slice %311 {offsets = [0, 8], sizes = [8, 8], strides = [1, 1]} : vector<8x32xf32> to vector<8x8xf32>
    %331 = vector.extract_strided_slice %312 {offsets = [0, 8], sizes = [8, 8], strides = [1, 1]} : vector<8x32xf32> to vector<8x8xf32>
    %cst_113 = arith.constant dense<0.000000e+00> : vector<8x8xf32>
    %332 = tpu.matmul %329, %330, %cst_113 {dimension_numbers = #tpu.dot_dimension_numbers<[1], [1], [0], [0], [0, 0, 1, 0], [], []>} : vector<8x8xf32>, vector<8x8xf32>, vector<8x8xf32> -> vector<8x8xf32>
    %cst_114 = arith.constant 0.353553385 : f32
    %333 = vector.broadcast %cst_114 : f32 to vector<8x8xf32>
    %334 = arith.mulf %332, %333 : vector<8x8xf32>
    %cst_115 = arith.constant dense<0xFF800000> : vector<8xf32>
    %335 = vector.multi_reduction <maximumf>, %334, %cst_115 [1] : vector<8x8xf32> to vector<8xf32>
    %336 = vector.shape_cast %335 : vector<8xf32> to vector<8x1xf32>
    %337 = vector.broadcast %336 : vector<8x1xf32> to vector<8x8xf32>
    %338 = arith.subf %334, %337 : vector<8x8xf32>
    %339 = math.exp %338 : vector<8x8xf32>
    %cst_116 = arith.constant dense<0.000000e+00> : vector<8xf32>
    %340 = vector.multi_reduction <add>, %339, %cst_116 [1] : vector<8x8xf32> to vector<8xf32>
    %341 = vector.shape_cast %340 : vector<8xf32> to vector<8x1xf32>
    %342 = vector.broadcast %341 : vector<8x1xf32> to vector<8x8xf32>
    %343 = arith.divf %339, %342 : vector<8x8xf32>
    %cst_117 = arith.constant dense<0.000000e+00> : vector<8x8xf32>
    %344 = tpu.matmul %343, %331, %cst_117 {dimension_numbers = #tpu.dot_dimension_numbers<[1], [0], [0], [1], [0, 0, 1, 1], [], []>} : vector<8x8xf32>, vector<8x8xf32>, vector<8x8xf32> -> vector<8x8xf32>
    %345 = vector.extract_strided_slice %310 {offsets = [0, 16], sizes = [8, 8], strides = [1, 1]} : vector<8x32xf32> to vector<8x8xf32>
    %346 = vector.extract_strided_slice %311 {offsets = [0, 16], sizes = [8, 8], strides = [1, 1]} : vector<8x32xf32> to vector<8x8xf32>
    %347 = vector.extract_strided_slice %312 {offsets = [0, 16], sizes = [8, 8], strides = [1, 1]} : vector<8x32xf32> to vector<8x8xf32>
    %cst_118 = arith.constant dense<0.000000e+00> : vector<8x8xf32>
    %348 = tpu.matmul %345, %346, %cst_118 {dimension_numbers = #tpu.dot_dimension_numbers<[1], [1], [0], [0], [0, 0, 1, 0], [], []>} : vector<8x8xf32>, vector<8x8xf32>, vector<8x8xf32> -> vector<8x8xf32>
    %cst_119 = arith.constant 0.353553385 : f32
    %349 = vector.broadcast %cst_119 : f32 to vector<8x8xf32>
    %350 = arith.mulf %348, %349 : vector<8x8xf32>
    %cst_120 = arith.constant dense<0xFF800000> : vector<8xf32>
    %351 = vector.multi_reduction <maximumf>, %350, %cst_120 [1] : vector<8x8xf32> to vector<8xf32>
    %352 = vector.shape_cast %351 : vector<8xf32> to vector<8x1xf32>
    %353 = vector.broadcast %352 : vector<8x1xf32> to vector<8x8xf32>
    %354 = arith.subf %350, %353 : vector<8x8xf32>
    %355 = math.exp %354 : vector<8x8xf32>
    %cst_121 = arith.constant dense<0.000000e+00> : vector<8xf32>
    %356 = vector.multi_reduction <add>, %355, %cst_121 [1] : vector<8x8xf32> to vector<8xf32>
    %357 = vector.shape_cast %356 : vector<8xf32> to vector<8x1xf32>
    %358 = vector.broadcast %357 : vector<8x1xf32> to vector<8x8xf32>
    %359 = arith.divf %355, %358 : vector<8x8xf32>
    %cst_122 = arith.constant dense<0.000000e+00> : vector<8x8xf32>
    %360 = tpu.matmul %359, %347, %cst_122 {dimension_numbers = #tpu.dot_dimension_numbers<[1], [0], [0], [1], [0, 0, 1, 1], [], []>} : vector<8x8xf32>, vector<8x8xf32>, vector<8x8xf32> -> vector<8x8xf32>
    %361 = vector.extract_strided_slice %310 {offsets = [0, 24], sizes = [8, 8], strides = [1, 1]} : vector<8x32xf32> to vector<8x8xf32>
    %362 = vector.extract_strided_slice %311 {offsets = [0, 24], sizes = [8, 8], strides = [1, 1]} : vector<8x32xf32> to vector<8x8xf32>
    %363 = vector.extract_strided_slice %312 {offsets = [0, 24], sizes = [8, 8], strides = [1, 1]} : vector<8x32xf32> to vector<8x8xf32>
    %cst_123 = arith.constant dense<0.000000e+00> : vector<8x8xf32>
    %364 = tpu.matmul %361, %362, %cst_123 {dimension_numbers = #tpu.dot_dimension_numbers<[1], [1], [0], [0], [0, 0, 1, 0], [], []>} : vector<8x8xf32>, vector<8x8xf32>, vector<8x8xf32> -> vector<8x8xf32>
    %cst_124 = arith.constant 0.353553385 : f32
    %365 = vector.broadcast %cst_124 : f32 to vector<8x8xf32>
    %366 = arith.mulf %364, %365 : vector<8x8xf32>
    %cst_125 = arith.constant dense<0xFF800000> : vector<8xf32>
    %367 = vector.multi_reduction <maximumf>, %366, %cst_125 [1] : vector<8x8xf32> to vector<8xf32>
    %368 = vector.shape_cast %367 : vector<8xf32> to vector<8x1xf32>
    %369 = vector.broadcast %368 : vector<8x1xf32> to vector<8x8xf32>
    %370 = arith.subf %366, %369 : vector<8x8xf32>
    %371 = math.exp %370 : vector<8x8xf32>
    %cst_126 = arith.constant dense<0.000000e+00> : vector<8xf32>
    %372 = vector.multi_reduction <add>, %371, %cst_126 [1] : vector<8x8xf32> to vector<8xf32>
    %373 = vector.shape_cast %372 : vector<8xf32> to vector<8x1xf32>
    %374 = vector.broadcast %373 : vector<8x1xf32> to vector<8x8xf32>
    %375 = arith.divf %371, %374 : vector<8x8xf32>
    %cst_127 = arith.constant dense<0.000000e+00> : vector<8x8xf32>
    %376 = tpu.matmul %375, %363, %cst_127 {dimension_numbers = #tpu.dot_dimension_numbers<[1], [0], [0], [1], [0, 0, 1, 1], [], []>} : vector<8x8xf32>, vector<8x8xf32>, vector<8x8xf32> -> vector<8x8xf32>
    %377 = tpu.concatenate %328, %344, %360, %376 in 1 : vector<8x8xf32>, vector<8x8xf32>, vector<8x8xf32>, vector<8x8xf32> -> vector<8x32xf32>
    %378 = tpu.concatenate %309, %377 in 0 : vector<8x32xf32>, vector<8x32xf32> -> vector<16x32xf32>
    %cst_128 = arith.constant dense<0.000000e+00> : vector<16x32xf32>
    %379 = tpu.matmul %378, %2, %cst_128 {dimension_numbers = #tpu.dot_dimension_numbers<[1], [0], [0], [1], [0, 0, 1, 1], [], []>} : vector<16x32xf32>, vector<32x32xf32>, vector<16x32xf32> -> vector<16x32xf32>
    %380 = arith.addf %379, %10 : vector<16x32xf32>
    %381 = arith.addf %236, %380 : vector<16x32xf32>
    %cst_129 = arith.constant dense<0.000000e+00> : vector<16xf32>
    %382 = vector.multi_reduction <add>, %381, %cst_129 [1] : vector<16x32xf32> to vector<16xf32>
    %383 = vector.shape_cast %382 : vector<16xf32> to vector<16x1xf32>
    %cst_130 = arith.constant 3.200000e+01 : f32
    %384 = vector.broadcast %cst_130 : f32 to vector<16x1xf32>
    %385 = arith.divf %383, %384 : vector<16x1xf32>
    %386 = vector.broadcast %385 : vector<16x1xf32> to vector<16x32xf32>
    %387 = arith.subf %381, %386 : vector<16x32xf32>
    %388 = arith.mulf %387, %387 : vector<16x32xf32>
    %cst_131 = arith.constant dense<0.000000e+00> : vector<16xf32>
    %389 = vector.multi_reduction <add>, %388, %cst_131 [1] : vector<16x32xf32> to vector<16xf32>
    %390 = vector.shape_cast %389 : vector<16xf32> to vector<16x1xf32>
    %cst_132 = arith.constant 3.200000e+01 : f32
    %391 = vector.broadcast %cst_132 : f32 to vector<16x1xf32>
    %392 = arith.divf %390, %391 : vector<16x1xf32>
    %393 = vector.broadcast %385 : vector<16x1xf32> to vector<16x32xf32>
    %394 = arith.subf %381, %393 : vector<16x32xf32>
    %cst_133 = arith.constant 9.99999996E-13 : f32
    %395 = vector.broadcast %cst_133 : f32 to vector<16x1xf32>
    %396 = arith.addf %392, %395 : vector<16x1xf32>
    %397 = math.rsqrt %396 : vector<16x1xf32>
    %398 = vector.broadcast %397 : vector<16x1xf32> to vector<16x32xf32>
    %399 = arith.mulf %394, %398 : vector<16x32xf32>
    %400 = arith.mulf %399, %13 : vector<16x32xf32>
    %401 = arith.addf %400, %16 : vector<16x32xf32>
    %cst_134 = arith.constant dense<0.000000e+00> : vector<16x64xf32>
    %402 = tpu.matmul %401, %3, %cst_134 {dimension_numbers = #tpu.dot_dimension_numbers<[1], [0], [0], [1], [0, 0, 1, 1], [], []>} : vector<16x32xf32>, vector<32x64xf32>, vector<16x64xf32> -> vector<16x64xf32>
    %403 = arith.addf %402, %19 : vector<16x64xf32>
    %cst_135 = arith.constant 5.000000e-01 : f32
    %404 = vector.broadcast %cst_135 : f32 to vector<16x64xf32>
    %405 = arith.mulf %404, %403 : vector<16x64xf32>
    %cst_136 = arith.constant 4.471500e-02 : f32
    %406 = vector.broadcast %cst_136 : f32 to vector<16x64xf32>
    %407 = arith.mulf %406, %403 : vector<16x64xf32>
    %408 = arith.mulf %407, %403 : vector<16x64xf32>
    %409 = arith.mulf %408, %403 : vector<16x64xf32>
    %410 = arith.addf %403, %409 : vector<16x64xf32>
    %cst_137 = arith.constant 0.797884583 : f32
    %411 = vector.broadcast %cst_137 : f32 to vector<16x64xf32>
    %412 = arith.mulf %411, %410 : vector<16x64xf32>
    %413 = math.tanh %412 : vector<16x64xf32>
    %cst_138 = arith.constant 1.000000e+00 : f32
    %414 = vector.broadcast %cst_138 : f32 to vector<16x64xf32>
    %415 = arith.addf %414, %413 : vector<16x64xf32>
    %416 = arith.mulf %405, %415 : vector<16x64xf32>
    %cst_139 = arith.constant dense<0.000000e+00> : vector<16x32xf32>
    %417 = tpu.matmul %416, %4, %cst_139 {dimension_numbers = #tpu.dot_dimension_numbers<[1], [0], [0], [1], [0, 0, 1, 1], [], []>} : vector<16x64xf32>, vector<64x32xf32>, vector<16x32xf32> -> vector<16x32xf32>
    %418 = arith.addf %417, %22 : vector<16x32xf32>
    %419 = arith.addf %418, %401 : vector<16x32xf32>
    %cst_140 = arith.constant dense<0.000000e+00> : vector<16xf32>
    %420 = vector.multi_reduction <add>, %419, %cst_140 [1] : vector<16x32xf32> to vector<16xf32>
    %421 = vector.shape_cast %420 : vector<16xf32> to vector<16x1xf32>
    %cst_141 = arith.constant 3.200000e+01 : f32
    %422 = vector.broadcast %cst_141 : f32 to vector<16x1xf32>
    %423 = arith.divf %421, %422 : vector<16x1xf32>
    %424 = vector.broadcast %423 : vector<16x1xf32> to vector<16x32xf32>
    %425 = arith.subf %419, %424 : vector<16x32xf32>
    %426 = arith.mulf %425, %425 : vector<16x32xf32>
    %cst_142 = arith.constant dense<0.000000e+00> : vector<16xf32>
    %427 = vector.multi_reduction <add>, %426, %cst_142 [1] : vector<16x32xf32> to vector<16xf32>
    %428 = vector.shape_cast %427 : vector<16xf32> to vector<16x1xf32>
    %cst_143 = arith.constant 3.200000e+01 : f32
    %429 = vector.broadcast %cst_143 : f32 to vector<16x1xf32>
    %430 = arith.divf %428, %429 : vector<16x1xf32>
    %431 = vector.broadcast %423 : vector<16x1xf32> to vector<16x32xf32>
    %432 = arith.subf %419, %431 : vector<16x32xf32>
    %cst_144 = arith.constant 9.99999996E-13 : f32
    %433 = vector.broadcast %cst_144 : f32 to vector<16x1xf32>
    %434 = arith.addf %430, %433 : vector<16x1xf32>
    %435 = math.rsqrt %434 : vector<16x1xf32>
    %436 = vector.broadcast %435 : vector<16x1xf32> to vector<16x32xf32>
    %437 = arith.mulf %432, %436 : vector<16x32xf32>
    %438 = arith.mulf %437, %25 : vector<16x32xf32>
    %439 = arith.addf %438, %28 : vector<16x32xf32>
    %c0_145 = arith.constant 0 : index
    %c0_146 = arith.constant 0 : index
    %440 = vector.load %arg15[%c0_145, %c0_146] : memref<16x32xf32, #tpu.memory_space<vmem>>, vector<16x32xf32>
    tpu.vector_store %arg15[%c0_145, %c0_146], %439 {strides = array<i32>} : memref<16x32xf32, #tpu.memory_space<vmem>>, vector<16x32xf32>,
    return
  }
}

</mosaic_0001>

<bundles_post_ra>
// kernel: albert_transformer.1
= control target key start
LH: loop header
LB: loop body
LE: loop exit
PB: predicated region body
PF: predicated region fallthrough
CT: control target
= control target key end

     0   :  { %20 = vsyncpa [#allocation3], 0  ;;  %s3128_s0 = inlined_call_operand.hbm [shape: f32[16,16], index: 0, kind: input, shape index: {}]   ;;  %s3129_s1 = inlined_call_operand.hbm [shape: f32[16,32], index: 1, kind: input, shape index: {}]   ;;  %s3130_s2 = inlined_call_operand.vmem [shape: f32[1,32], index: 2, kind: input, shape index: {}]   ;;  %s3131_s3 = inlined_call_operand.vmem [shape: f32[32,96], index: 3, kind: input, shape index: {}]   ;;  %s3132_s4 = inlined_call_operand.vmem [shape: f32[1,96], index: 4, kind: input, shape index: {}]   ;;  %s3133_s5 = inlined_call_operand.vmem [shape: f32[32,32], index: 5, kind: input, shape index: {}]   ;;  %s3134_s6 = inlined_call_operand.hbm [shape: f32[1,32], index: 6, kind: input, shape index: {}]   ;;  %s3135_s7 = inlined_call_operand.vmem [shape: f32[1,32], index: 7, kind: input, shape index: {}]   ;;  %s3136_s8 = inlined_call_operand.vmem [shape: f32[1,32], index: 8, kind: input, shape index: {}]   ;;  %s3137_s9 = inlined_call_operand.vmem [shape: f32[32,64], index: 9, kind: input, shape index: {}]   ;;  %s3138_s10 = inlined_call_operand.hbm [shape: f32[1,64], index: 10, kind: input, shape index: {}]   ;;  %s3139_s11 = inlined_call_operand.vmem [shape: f32[64,32], index: 11, kind: input, shape index: {}]   ;;  %s3140_s12 = inlined_call_operand.hbm [shape: f32[1,32], index: 12, kind: input, shape index: {}]   ;;  %s3141_s13 = inlined_call_operand.vmem [shape: f32[1,32], index: 13, kind: input, shape index: {}]   ;;  %s3142_s14 = inlined_call_operand.hbm [shape: f32[1,32], index: 14, kind: input, shape index: {}]   ;;  %s3143_s15 = inlined_call_operand.hbm [shape: f32[16,32], index: 15, kind: output, shape index: {}]  }
   0x1   :  { %21 = vsyncpa [#allocation6], 0 }
   0x2   :  { %22 = vsyncpa [#allocation9], 0 }
   0x3   :  { %23 = vsyncpa [#allocation12], 0 }
   0x4   :  { %24 = vsyncpa [#allocation4], 0  ;;  %s42_s20 = sshll.u32 %s3129_s1, 4  ;;  %s2428_s21 = smov [#allocation5]   ;;  %s43_s20 = int_to_ptr.hbm [resolvable:$true] %s42_s20 }
   0x5   :  { %s44_s22 = sshll.u32 %s2428_s21, 4  ;;  %s81_s25 = sshll.u32 %s3138_s10, 4  ;;  %s45_s22 = int_to_ptr.vmem [resolvable:$true] %s44_s22  ;;  %s82_s25 = int_to_ptr.hbm [resolvable:$true] %s81_s25 }
   0x6   :  { %s2429_s26 = smov 128   ;;  %s2430_s27 = smov 8  }
   0x7   :  { %50 = dma.hbm_to_vmem [thread:$0]  %s43_s20, 256, %s45_s22, [#allocation6], %s2429_s26, %s2429_s26, %s2430_s27  }
   0x8   :  { %s2431_s28 = smov [#allocation8]   ;;  %s29_s1 = sshll.u32 %s3128_s0, 4  ;;  %s30_s1 = int_to_ptr.hbm [resolvable:$true] %s29_s1 }
   0x9   :  { %s83_s29 = sshll.u32 %s2431_s28, 4  ;;  %s64_s10 = sshll.u32 %s3134_s6, 4  ;;  %s84_s29 = int_to_ptr.vmem [resolvable:$true] %s83_s29  ;;  %s65_s10 = int_to_ptr.hbm [resolvable:$true] %s64_s10 }
   0xa   :  { %86 = dma.hbm_to_vmem [thread:$0]  %s82_s25, 16, %s84_s29, [#allocation9]  }
   0xb   :  { %s2432_s19 = smov [#allocation2]   ;;  %s2433_s20 = smov [#allocation7]  }
   0xc   :  { %s31_s21 = sshll.u32 %s2432_s19, 4  ;;  %s66_s22 = sshll.u32 %s2433_s20, 4  ;;  %s32_s21 = int_to_ptr.vmem [resolvable:$true] %s31_s21  ;;  %s67_s22 = int_to_ptr.vmem [resolvable:$true] %s66_s22 }
   0xd   :  { %37 = dma.hbm_to_vmem [thread:$0]  %s30_s1, 256, %s32_s21, [#allocation3], %s2429_s26, %s2429_s26, %s2430_s27  }
   0xe   :  { %s94_s0 = sshll.u32 %s3140_s12, 4  ;;  %s107_s6 = sshll.u32 %s3142_s14, 4  ;;  %s95_s0 = int_to_ptr.hbm [resolvable:$true] %s94_s0  ;;  %s108_s6 = int_to_ptr.hbm [resolvable:$true] %s107_s6 }
   0xf   :  { %69 = dma.hbm_to_vmem [thread:$0]  %s65_s10, 16, %s67_s22, [#allocation6]  }
  0x10   :  { %s2434_s29 = smov [#allocation10]   ;;  %s2435_s16 = smov [#allocation11]  }
  0x11   :  { %s96_s30 = sshll.u32 %s2434_s29, 4  ;;  %s109_s1 = sshll.u32 %s2435_s16, 4  ;;  %s97_s30 = int_to_ptr.vmem [resolvable:$true] %s96_s30  ;;  %s110_s1 = int_to_ptr.vmem [resolvable:$true] %s109_s1 }
  0x12   :  { %99 = dma.hbm_to_vmem [thread:$0]  %s95_s0, 16, %s97_s30, [#allocation9]  }
  0x13   :  { %112 = dma.hbm_to_vmem [thread:$0]  %s108_s6, 16, %s110_s1, [#allocation12]  }
  0x14   :  { %2418 = dma.done.wait [#allocation3], 256  }
  0x15   :  { %2419 = vsyncadd [#allocation3], 4294967040 }
  0x16   :  { %2420 = dma.done.wait [#allocation6], 272  }
  0x17   :  { %2421 = vsyncadd [#allocation6], 4294967024 }
  0x18   :  { %2422 = dma.done.wait [#allocation9], 32  }
  0x19   :  { %2423 = vsyncadd [#allocation9], 4294967264 }
  0x1a   :  { %2424 = dma.done.wait [#allocation12], 16  }
  0x1b   :  { %2425 = vsyncadd [#allocation12], 4294967280  ;;  %v192_v0 = vld [vmem:[#allocation5 + $0x8] sm:$0xff]  ;;  %v191_v1 = vld [vmem:[#allocation5] sm:$0xff]  ;;  %vm197_vm0 = vcmask 130048   ;;  %vm227_vm1 = vcmask 261120  }
  0x1c   :  { %v137_v2 = vld [vmem:[#allocation2] sm:$0xff]  ;;  %218 = vmatpush.msra.mxu0 %v192_v0  ;;  %v2558_v3 = vld [vmem:[%s3131_s3 + $0x18] sm:$0xff]  ;;  %v2563_v4 = vld [vmem:[%s3131_s3 + $0x10] sm:$0xff]  ;;  %s2438_s25 = smov 120   ;;  %vm260_vm2 = vcmask 64512   ;;  %s2439_s28 = smov 56  }
  0x1d   :  { %246 = vmatpush.msra.mxu1 %v2558_v3  ;;  %2116 = vmatpush.msra.mxu3 %v2558_v3  ;;  %v2573_v5 = vld [vmem:[%s3131_s3 + $0x8] sm:$0xff]  ;;  %v2580_v6 = vld [vmem:[%s3131_s3] sm:$0xff]  ;;  %s2436_s3 = smov 88   ;;  %s2440_s6 = smov 72  }
  0x1e   :  { %219 = vmatpush.msra.mxu0 %v191_v1  ;;  %v2143_v7 = vld [vmem:[%s3130_s2] ss:$0 sm:$0xff]  ;;  %s2437_s2 = smov 96   ;;  %s2441_s29 = smov 104   ;;  %v138_v17 = vld [vmem:[#allocation2 + $0x8] sm:$0xff] }
  0x1f   :  { %2050 = vmatmul.msk.f32.vlgmr.msra.gmra.mxu0 %vm197_vm0, %v137_v2  ;;  %247 = vmatpush.msra.mxu1 %v2563_v4  ;;  %v2594_v10 = vld [vmem:[%s3132_s4] ss:$0 sm:$0xff]  ;;  %s2442_s30 = smov 64   ;;  %s2443_s16 = smov 80  }
  0x20   :  { %2117 = vmatpush.msra.mxu3 %v2563_v4  ;;  %s2444_s1 = smov 112   ;;  %s2445_s12 = smov 48  }
  0x21   :  { %248 = vmatpush.msra.mxu1 %v2573_v5  ;;  %s2446_s14 = smov 40   ;;  %s2447_s17 = smov 16  }
  0x22   :  { %2118 = vmatpush.msra.mxu3 %v2573_v5  ;;  %s2448_s18 = smov 24  }
  0x23   :  { %249 = vmatpush.msra.mxu1 %v2580_v6 }
  0x24   :  { %2119 = vmatpush.msra.mxu3 %v2580_v6 }
  0x27   :  { %2051 = vmatmul.msk.f32.gmra.mxu0 %vm197_vm0, %v138_v17 }
  0x9c   :  { %v221_v8 = vpop.f32.mrf.mxu0 }
  0x9d   :  { %v2587_v9 = vadd.f32 %v2143_v7, %v221_v8 }
  0x9f   :  { %2052 = vmatmul.msk.f32.vlgmr.msra.gmra.mxu1 %vm227_vm1, %v2587_v9 }
  0xa4   :  { %v224_v25 = vpop.f32.mrf.mxu0 }
  0xa5   :  { %v2620_v26 = vadd.f32 %v2143_v7, %v224_v25 }
  0xa7   :  { %2053 = vmatmul.msk.f32.vlgmr.msra.gmra.mxu3 %vm227_vm1, %v2620_v26 }
 0x11c   :  { %v251_v11 = vpop.f32.mrf.mxu1 }
 0x11d   :  { %v2597_v12 = vadd.f32 %v2594_v10, %v251_v11 }
 0x11f   :  { %338 = vrot.lane.b32.xlu2 %v2597_v12, %s2436_s3  ;;  %258 = vrot.lane.b32.xlu0 %v2597_v12, %s2437_s2 }
 0x127   :  { %336 = vrot.lane.b32.xlu2 %v2597_v12, %s2438_s25 }
 0x12a   :  { %v254_v42 = vpop.f32.mrf.mxu3 }
 0x12b   :  { %v2646_v17 = vadd.f32 %v2594_v10, %v254_v42 }
 0x179   :  { %v339_v38 = vpop.permute.xlu2 %338 }
 0x181   :  { %v337_v41 = vpop.permute.xlu2 %336 }
 0x191   :  { %v259_v13 = vpop.permute.xlu0 %258 }
 0x192   :  { %2054 = vmatpush.xpose.msk.msra.mxu2 %vm260_vm2, %v259_v13 }
 0x195   :  { %2055 = vmatmul.msk.f32.vlgmr.msra.gmra.mxu2 %vm260_vm2, %v2597_v12 }
 0x218   :  { %v282_v14 = vpop.f32.mrf.mxu2 }
 0x219   :  { %v285_v15 = vmul.f32 0.35355338, %v282_v14 }
 0x21b   :  { %v286_v16 = vsel %vm260_vm2, %v285_v15, -inf }
 0x21c   :  { %287 = vmax.xlane.f32.xlu0 %v286_v16 }
 0x230   :  { %389 = vrot.lane.b32.xlu0 %v2597_v12, %s2439_s28 }
 0x238   :  { %496 = vrot.lane.b32.xlu0 %v2597_v12, %s2440_s6 }
 0x240   :  { %494 = vrot.lane.b32.xlu0 %v2597_v12, %s2441_s29 }
 0x28f   :  { %v288_v18 = vpop.xlane.xlu0 %287 }
 0x290   :  { %v289_v19 = vsub.f32 %v285_v15, %v288_v18 }
 0x292   :  { %v290_v20 = vmul.f32 1.442695, %v289_v19 }
 0x294   :  { %2152 = vpow2.f32 %v290_v20 }
 0x29a   :  { %v2153_v21 = vpop.eup %2152 }
 0x29b   :  { %v292_v22 = vsel %vm260_vm2, %v2153_v21, 0.0 }
 0x29c   :  { %293 = vadd.xlane.f32.xlu1 %v292_v22 }
 0x2a2   :  { %v390_v23 = vpop.permute.xlu0 %389 }
 0x2a3   :  { %410 = vmatpush.msrb.mxu2 %v390_v23 }
 0x2aa   :  { %v497_v24 = vpop.permute.xlu0 %496 }
 0x2ab   :  { %2063 = vmatpush.xpose.msk.msra.mxu2 %vm260_vm2, %v497_v24 }
 0x2b2   :  { %v495_v2 = vpop.permute.xlu0 %494 }
 0x2b5   :  { %310 = vrot.lane.b32.xlu1 %v2597_v12, %s2442_s30 }
 0x30f   :  { %v294_v27 = vpop.xlane.xlu1 %293 }
 0x310   :  { %2154 = vrcp.f32 %v294_v27  ;;  %v306_v33 = vand.u32 2147483648, %v294_v27  ;;  %vm300_vm4 = vweird.f32 %v294_v27  ;;  %v304_v34 = vand.u32 2147483647, %v294_v27 }
 0x312   :  { %v307_v36 = vor.u32 1.1754944e-38, %v306_v33  ;;  %vm305_vm6 = vcmp.eq.f32.partialorder %v304_v34, 8.507059e+37 }
 0x316   :  { %v2155_v28 = vpop.eup %2154 }
 0x317   :  { %v296_v29 = vmul.f32 %v2155_v28, %v294_v27  ;;  %vm301_vm3 = vweird.f32 %v2155_v28 }
 0x318   :  { %vm302_vm5 = vmor %vm300_vm4, %vm301_vm3 }
 0x319   :  { %v297_v30 = vsub.f32 1.0, %v296_v29 }
 0x31b   :  { %v298_v31 = vmul.f32 %v2155_v28, %v297_v30 }
 0x31d   :  { %v299_v32 = vadd.f32 %v2155_v28, %v298_v31 }
 0x31f   :  { %v303_v35 = vsel %vm302_vm5, %v2155_v28, %v299_v32 }
 0x320   :  { %v308_v37 = vsel %vm305_vm6, %v307_v36, %v303_v35  ;;  %vm587_vm6 = vcmask 195584  }
 0x321   :  { %v309_v40 = vmul.f32 %v2153_v21, %v308_v37 }
 0x327   :  { %v311_v39 = vpop.permute.xlu1 %310 }
 0x328   :  { %331 = vmatpush.msrb.mxu3 %v311_v39 }
 0x329   :  { %2056 = vmatmul.msk.f32.vlgmr.msrb.gmra.mxu3 %vm260_vm2, %v309_v40 }
 0x32a   :  { %2057 = vmatpush.xpose.msk.msra.mxu3 %vm260_vm2, %v339_v38 }
 0x331   :  { %2058 = vmatmul.msk.f32.vlgmr.msra.gmra.mxu3 %vm260_vm2, %v337_v41 }
 0x3ac   :  { %v2627_v43 = vpop.f32.mrf.mxu3 }
 0x3b4   :  { %v361_v44 = vpop.f32.mrf.mxu3 }
 0x3b5   :  { %v364_v45 = vmul.f32 0.35355338, %v361_v44 }
 0x3b7   :  { %v365_v46 = vsel %vm260_vm2, %v364_v45, -inf }
 0x3b8   :  { %366 = vmax.xlane.f32.xlu2 %v365_v46 }
 0x3d0   :  { %417 = vrot.lane.b32.xlu2 %v2597_v12, %s2443_s16 }
 0x42b   :  { %v367_v47 = vpop.xlane.xlu2 %366 }
 0x42c   :  { %v368_v48 = vsub.f32 %v364_v45, %v367_v47 }
 0x42e   :  { %v369_v49 = vmul.f32 1.442695, %v368_v48 }
 0x430   :  { %2156 = vpow2.f32 %v369_v49 }
 0x433   :  { %v418_v50 = vpop.permute.xlu2 %417 }
 0x434   :  { %2060 = vmatpush.xpose.msk.msrb.mxu3 %vm260_vm2, %v418_v50 }
 0x436   :  { %v2157_v51 = vpop.eup %2156 }
 0x437   :  { %v371_v52 = vsel %vm260_vm2, %v2157_v51, 0.0 }
 0x438   :  { %372 = vadd.xlane.f32.xlu1 %v371_v52 }
 0x451   :  { %415 = vrot.lane.b32.xlu1 %v2597_v12, %s2444_s1 }
 0x4ab   :  { %v373_v53 = vpop.xlane.xlu1 %372 }
 0x4ac   :  { %2158 = vrcp.f32 %v373_v53  ;;  %v385_v57 = vand.u32 2147483648, %v373_v53  ;;  %v383_v59 = vand.u32 2147483647, %v373_v53  ;;  %vm379_vm8 = vweird.f32 %v373_v53 }
 0x4ae   :  { %v386_v61 = vor.u32 1.1754944e-38, %v385_v57  ;;  %vm384_vm10 = vcmp.eq.f32.partialorder %v383_v59, 8.507059e+37 }
 0x4b2   :  { %v2159_v54 = vpop.eup %2158 }
 0x4b3   :  { %v375_v55 = vmul.f32 %v2159_v54, %v373_v53  ;;  %vm380_vm7 = vweird.f32 %v2159_v54 }
 0x4b4   :  { %vm381_vm9 = vmor %vm379_vm8, %vm380_vm7 }
 0x4b5   :  { %v376_v56 = vsub.f32 1.0, %v375_v55 }
 0x4b7   :  { %v377_v58 = vmul.f32 %v2159_v54, %v376_v56 }
 0x4b9   :  { %v378_v60 = vadd.f32 %v2159_v54, %v377_v58 }
 0x4bb   :  { %v382_v62 = vsel %vm381_vm9, %v2159_v54, %v378_v60 }
 0x4bc   :  { %v387_v63 = vsel %vm384_vm10, %v386_v61, %v382_v62 }
 0x4bd   :  { %v388_v0 = vmul.f32 %v2157_v51, %v387_v63 }
 0x4bf   :  { %2059 = vmatmul.msk.f32.vlgmr.msrb.gmra.mxu2 %vm260_vm2, %v388_v0 }
 0x4c3   :  { %v416_v1 = vpop.permute.xlu1 %415 }
 0x4c4   :  { %2061 = vmatmul.msk.f32.vlgmr.msrb.gmra.mxu3 %vm260_vm2, %v416_v1  ;;  %v2681_v1 = vld [vmem:[%s3133_s5 + $0x18] sm:$0xff] }
 0x4c7   :  { %2064 = vmatmul.msk.f32.vlgmr.msra.gmra.mxu2 %vm260_vm2, %v495_v2  ;;  %v2686_v2 = vld [vmem:[%s3133_s5 + $0x10] sm:$0xff] }
 0x542   :  { %v412_v7 = vpop.f32.mrf.mxu2 }
 0x547   :  { %v440_v8 = vpop.f32.mrf.mxu3 }
 0x548   :  { %v443_v11 = vmul.f32 0.35355338, %v440_v8 }
 0x54a   :  { %v519_v13 = vpop.f32.mrf.mxu2  ;;  %v444_v14 = vsel %vm260_vm2, %v443_v11, -inf }
 0x54b   :  { %v522_v15 = vmul.f32 0.35355338, %v519_v13  ;;  %445 = vmax.xlane.f32.xlu2 %v444_v14 }
 0x54d   :  { %v523_v16 = vsel %vm260_vm2, %v522_v15, -inf }
 0x54e   :  { %524 = vmax.xlane.f32.xlu0 %v523_v16 }
 0x562   :  { %468 = vrot.lane.b32.xlu0 %v2597_v12, %s2445_s12 }
 0x563   :  { %547 = vrot.lane.b32.xlu2 %v2597_v12, %s2446_s14 }
 0x56a   :  { %669 = vrot.lane.b32.xlu0 %v2646_v17, %s2436_s3 }
 0x56b   :  { %667 = vrot.lane.b32.xlu2 %v2646_v17, %s2438_s25 }
 0x572   :  { %748 = vrot.lane.b32.xlu0 %v2646_v17, %s2443_s16 }
 0x57a   :  { %746 = vrot.lane.b32.xlu0 %v2646_v17, %s2444_s1 }
 0x5be   :  { %v446_v18 = vpop.xlane.xlu2 %445 }
 0x5bf   :  { %v447_v19 = vsub.f32 %v443_v11, %v446_v18 }
 0x5c1   :  { %v448_v20 = vmul.f32 1.442695, %v447_v19  ;;  %v525_v21 = vpop.xlane.xlu0 %524 }
 0x5c2   :  { %v526_v12 = vsub.f32 %v522_v15, %v525_v21  ;;  %v2697_v21 = vld [vmem:[%s3133_s5 + $0x8] sm:$0xff] }
 0x5c3   :  { %2160 = vpow2.f32 %v448_v20 }
 0x5c4   :  { %v527_v10 = vmul.f32 1.442695, %v526_v12  ;;  %v2703_v12 = vld [vmem:[%s3133_s5] sm:$0xff] }
 0x5c6   :  { %2162 = vpow2.f32 %v527_v10  ;;  %v548_v22 = vpop.permute.xlu2 %547 }
 0x5c7   :  { %568 = vmatpush.msrb.mxu1 %v548_v22 }
 0x5c9   :  { %v2161_v23 = vpop.eup %2160 }
 0x5ca   :  { %v450_v24 = vsel %vm260_vm2, %v2161_v23, 0.0 }
 0x5cb   :  { %451 = vadd.xlane.f32.xlu1 %v450_v24 }
 0x5cc   :  { %v2163_v25 = vpop.eup %2162 }
 0x5cd   :  { %v529_v27 = vsel %vm260_vm2, %v2163_v25, 0.0 }
 0x5ce   :  { %530 = vadd.xlane.f32.xlu2 %v529_v27  ;;  %v668_v30 = vpop.permute.xlu2 %667 }
 0x5d4   :  { %v469_v28 = vpop.permute.xlu0 %468 }
 0x5d5   :  { %489 = vmatpush.msrb.mxu0 %v469_v28 }
 0x5dc   :  { %v670_v29 = vpop.permute.xlu0 %669 }
 0x5dd   :  { %2069 = vmatpush.xpose.msk.msrb.mxu2 %vm260_vm2, %v670_v29 }
 0x5e0   :  { %2070 = vmatmul.msk.f32.vlgmr.msrb.gmra.mxu2 %vm260_vm2, %v668_v30 }
 0x5e4   :  { %590 = vrot.lane.b32.xlu1 %v2646_v17, %s2437_s2  ;;  %v749_v58 = vpop.permute.xlu0 %748 }
 0x5e6   :  { %827 = vrot.lane.b32.xlu2 %v2646_v17, %s2440_s6 }
 0x5ec   :  { %825 = vrot.lane.b32.xlu1 %v2646_v17, %s2441_s29  ;;  %v747_v60 = vpop.permute.xlu0 %746 }
 0x5ee   :  { %574 = vrot.lane.b32.xlu2 %v412_v7, %s2430_s27 }
 0x63e   :  { %v452_v31 = vpop.xlane.xlu1 %451 }
 0x63f   :  { %2164 = vrcp.f32 %v452_v31  ;;  %v464_v37 = vand.u32 2147483648, %v452_v31  ;;  %v462_v41 = vand.u32 2147483647, %v452_v31  ;;  %vm458_vm12 = vweird.f32 %v452_v31 }
 0x641   :  { %v531_v32 = vpop.xlane.xlu2 %530  ;;  %v465_v46 = vor.u32 1.1754944e-38, %v464_v37  ;;  %vm463_vm15 = vcmp.eq.f32.partialorder %v462_v41, 8.507059e+37 }
 0x642   :  { %2166 = vrcp.f32 %v531_v32  ;;  %v543_v45 = vand.u32 2147483648, %v531_v32  ;;  %v541_v48 = vand.u32 2147483647, %v531_v32  ;;  %vm537_vm3 = vweird.f32 %v531_v32 }
 0x644   :  { %v544_v52 = vor.u32 1.1754944e-38, %v543_v45  ;;  %vm542_vm5 = vcmp.eq.f32.partialorder %v541_v48, 8.507059e+37  ;;  %v2735_v48 = vld [vmem:[#allocation7] ss:$0 sm:$0xff] }
 0x645   :  { %v2165_v33 = vpop.eup %2164 }
 0x646   :  { %v454_v34 = vmul.f32 %v2165_v33, %v452_v31  ;;  %vm459_vm11 = vweird.f32 %v2165_v33 }
 0x647   :  { %vm460_vm13 = vmor %vm458_vm12, %vm459_vm11 }
 0x648   :  { %v2167_v35 = vpop.eup %2166  ;;  %v455_v36 = vsub.f32 1.0, %v454_v34 }
 0x649   :  { %v533_v38 = vmul.f32 %v2167_v35, %v531_v32  ;;  %v828_v39 = vpop.permute.xlu2 %827  ;;  %vm538_vm14 = vweird.f32 %v2167_v35 }
 0x64a   :  { %v456_v40 = vmul.f32 %v2165_v33, %v455_v36  ;;  %2075 = vmatpush.xpose.msk.msra.mxu2 %vm260_vm2, %v828_v39  ;;  %vm539_vm4 = vmor %vm537_vm3, %vm538_vm14 }
 0x64b   :  { %v534_v42 = vsub.f32 1.0, %v533_v38 }
 0x64c   :  { %v457_v44 = vadd.f32 %v2165_v33, %v456_v40 }
 0x64d   :  { %v535_v47 = vmul.f32 %v2167_v35, %v534_v42 }
 0x64e   :  { %v461_v49 = vsel %vm460_vm13, %v2165_v33, %v457_v44 }
 0x64f   :  { %v536_v50 = vadd.f32 %v2167_v35, %v535_v47  ;;  %v466_v51 = vsel %vm463_vm15, %v465_v46, %v461_v49 }
 0x650   :  { %v467_v53 = vmul.f32 %v2161_v23, %v466_v51 }
 0x651   :  { %v540_v54 = vsel %vm539_vm4, %v2167_v35, %v536_v50  ;;  %v575_v10 = vpop.permute.xlu2 %574 }
 0x652   :  { %2062 = vmatmul.msk.f32.vlgmr.msrb.gmra.mxu0 %vm260_vm2, %v467_v53  ;;  %v545_v55 = vsel %vm542_vm5, %v544_v52, %v540_v54  ;;  %v585_v23 = vsel %vm260_vm2, %v2627_v43, %v575_v10 }
 0x653   :  { %v546_v56 = vmul.f32 %v2163_v25, %v545_v55 }
 0x655   :  { %2065 = vmatmul.msk.f32.vlgmr.msrb.gmra.mxu1 %vm260_vm2, %v546_v56 }
 0x656   :  { %v591_v57 = vpop.permute.xlu1 %590 }
 0x657   :  { %2066 = vmatpush.xpose.msk.msra.mxu3 %vm260_vm2, %v591_v57 }
 0x65a   :  { %2067 = vmatmul.msk.f32.vlgmr.msra.gmra.mxu3 %vm260_vm2, %v2646_v17 }
 0x65b   :  { %2072 = vmatpush.xpose.msk.msrb.mxu3 %vm260_vm2, %v749_v58 }
 0x65e   :  { %v826_v59 = vpop.permute.xlu1 %825 }
 0x65f   :  { %2076 = vmatmul.msk.f32.vlgmr.msra.gmra.mxu2 %vm260_vm2, %v826_v59  ;;  %937 = vmatpush.msra.mxu3 %v2681_v1 }
 0x661   :  { %938 = vmatpush.msra.mxu3 %v2686_v2 }
 0x662   :  { %2073 = vmatmul.msk.f32.vlgmr.msrb.gmra.mxu3 %vm260_vm2, %v747_v60 }
 0x663   :  { %v692_v63 = vpop.f32.mrf.mxu2  ;;  %939 = vmatpush.msra.mxu3 %v2697_v21 }
 0x664   :  { %v695_v15 = vmul.f32 0.35355338, %v692_v63 }
 0x665   :  { %940 = vmatpush.msra.mxu3 %v2703_v12 }
 0x666   :  { %v696_v19 = vsel %vm260_vm2, %v695_v15, -inf }
 0x6cf   :  { %v491_v61 = vpop.f32.mrf.mxu0 }
 0x6d0   :  { %578 = vrot.lane.b32.xlu0 %v491_v61, %s2447_s17 }
 0x6d2   :  { %v570_v62 = vpop.f32.mrf.mxu1 }
 0x6d3   :  { %582 = vrot.lane.b32.xlu1 %v570_v62, %s2448_s18 }
 0x6dd   :  { %v613_v0 = vpop.f32.mrf.mxu3 }
 0x6de   :  { %v616_v7 = vmul.f32 0.35355338, %v613_v0 }
 0x6e0   :  { %v617_v8 = vsel %vm260_vm2, %v616_v7, -inf }
 0x6e1   :  { %618 = vmax.xlane.f32.xlu2 %v617_v8 }
 0x6e2   :  { %v850_v11 = vpop.f32.mrf.mxu2 }
 0x6e3   :  { %v853_v13 = vmul.f32 0.35355338, %v850_v11 }
 0x6e5   :  { %v854_v14 = vsel %vm260_vm2, %v853_v13, -inf  ;;  %v771_v16 = vpop.f32.mrf.mxu3 }
 0x6e6   :  { %v774_v18 = vmul.f32 0.35355338, %v771_v16 }
 0x6e8   :  { %v775_v20 = vsel %vm260_vm2, %v774_v18, -inf }
 0x6e9   :  { %855 = vmax.xlane.f32.xlu2 %v854_v14 }
 0x6fa   :  { %697 = vmax.xlane.f32.xlu0 %v696_v19 }
 0x6fd   :  { %776 = vmax.xlane.f32.xlu1 %v775_v20 }
 0x742   :  { %v579_v22 = vpop.permute.xlu0 %578 }
 0x743   :  { %v586_v24 = vsel %vm197_vm0, %v585_v23, %v579_v22 }
 0x745   :  { %v583_v25 = vpop.permute.xlu1 %582 }
 0x746   :  { %v588_v27 = vsel %vm587_vm6, %v586_v24, %v583_v25 }
 0x747   :  { %2078 = vmatmul.msk.f32.vlgmr.msra.gmra.mxu3 %vm227_vm1, %v588_v27 }
 0x754   :  { %v619_v28 = vpop.xlane.xlu2 %618 }
 0x755   :  { %v620_v29 = vsub.f32 %v616_v7, %v619_v28 }
 0x757   :  { %v621_v30 = vmul.f32 1.442695, %v620_v29 }
 0x759   :  { %2168 = vpow2.f32 %v621_v30 }
 0x75c   :  { %v856_v31 = vpop.xlane.xlu2 %855 }
 0x75d   :  { %v857_v32 = vsub.f32 %v853_v13, %v856_v31 }
 0x75f   :  { %v2711_v33 = vpop.eup %2168  ;;  %v858_v34 = vmul.f32 1.442695, %v857_v32 }
 0x760   :  { %v623_v35 = vsel %vm260_vm2, %v2711_v33, 0.0 }
 0x761   :  { %2170 = vpow2.f32 %v858_v34  ;;  %624 = vadd.xlane.f32.xlu0 %v623_v35 }
 0x767   :  { %v2715_v43 = vpop.eup %2170 }
 0x768   :  { %v860_v36 = vsel %vm260_vm2, %v2715_v43, 0.0 }
 0x769   :  { %861 = vadd.xlane.f32.xlu0 %v860_v36 }
 0x76d   :  { %v698_v37 = vpop.xlane.xlu0 %697 }
 0x76e   :  { %v699_v38 = vsub.f32 %v695_v15, %v698_v37 }
 0x770   :  { %v700_v39 = vmul.f32 1.442695, %v699_v38  ;;  %v777_v40 = vpop.xlane.xlu1 %776 }
 0x771   :  { %v778_v41 = vsub.f32 %v774_v18, %v777_v40 }
 0x772   :  { %2172 = vpow2.f32 %v700_v39 }
 0x773   :  { %v779_v42 = vmul.f32 1.442695, %v778_v41 }
 0x775   :  { %2174 = vpow2.f32 %v779_v42 }
 0x778   :  { %v2719_v44 = vpop.eup %2172 }
 0x779   :  { %v702_v45 = vsel %vm260_vm2, %v2719_v44, 0.0 }
 0x77a   :  { %703 = vadd.xlane.f32.xlu1 %v702_v45 }
 0x77b   :  { %v2723_v46 = vpop.eup %2174 }
 0x77c   :  { %v781_v47 = vsel %vm260_vm2, %v2723_v46, 0.0 }
 0x77d   :  { %799 = vrot.lane.b32.xlu0 %v2646_v17, %s2445_s12  ;;  %782 = vadd.xlane.f32.xlu2 %v781_v47 }
 0x785   :  { %878 = vrot.lane.b32.xlu0 %v2646_v17, %s2446_s14 }
 0x793   :  { %641 = vrot.lane.b32.xlu1 %v2646_v17, %s2442_s30 }
 0x795   :  { %720 = vrot.lane.b32.xlu2 %v2646_v17, %s2439_s28 }
 0x7ca   :  { %v942_v49 = vpop.f32.mrf.mxu3 }
 0x7cb   :  { %v943_v50 = vadd.f32 %v2735_v48, %v942_v49 }
 0x7cd   :  { %v2739_v51 = vadd.f32 %v943_v50, %v2587_v9 }
 0x7cf   :  { %v950_v52 = vsel %vm227_vm1, %v2739_v51, 0.0 }
 0x7d0   :  { %951 = vadd.xlane.f32.xlu1 %v950_v52 }
 0x7d4   :  { %v625_v53 = vpop.xlane.xlu0 %624 }
 0x7d5   :  { %2176 = vrcp.f32 %v625_v53  ;;  %vm631_vm10 = vweird.f32 %v625_v53  ;;  %v635_v23 = vand.u32 2147483647, %v625_v53  ;;  %v637_v24 = vand.u32 2147483648, %v625_v53 }
 0x7d7   :  { %v638_v36 = vor.u32 1.1754944e-38, %v637_v24  ;;  %vm636_vm4 = vcmp.eq.f32.partialorder %v635_v23, 8.507059e+37  ;;  %v2814_v23 = vld [vmem:[%s3136_s8] ss:$0 sm:$0xff] }
 0x7db   :  { %v2177_v55 = vpop.eup %2176 }
 0x7dc   :  { %v862_v54 = vpop.xlane.xlu0 %861  ;;  %v627_v17 = vmul.f32 %v2177_v55, %v625_v53  ;;  %vm632_vm8 = vweird.f32 %v2177_v55 }
 0x7dd   :  { %2178 = vrcp.f32 %v862_v54  ;;  %vm633_vm14 = vmor %vm631_vm10, %vm632_vm8  ;;  %vm868_vm15 = vweird.f32 %v862_v54  ;;  %v874_v29 = vand.u32 2147483648, %v862_v54  ;;  %v872_v32 = vand.u32 2147483647, %v862_v54 }
 0x7de   :  { %v628_v9 = vsub.f32 1.0, %v627_v17 }
 0x7df   :  { %v875_v39 = vor.u32 1.1754944e-38, %v874_v29  ;;  %vm873_vm5 = vcmp.eq.f32.partialorder %v872_v32, 8.507059e+37 }
 0x7e0   :  { %v629_v7 = vmul.f32 %v2177_v55, %v628_v9 }
 0x7e2   :  { %v630_v20 = vadd.f32 %v2177_v55, %v629_v7 }
 0x7e3   :  { %v2179_v57 = vpop.eup %2178 }
 0x7e4   :  { %v864_v60 = vmul.f32 %v2179_v57, %v862_v54  ;;  %vm869_vm12 = vweird.f32 %v2179_v57  ;;  %v634_v31 = vsel %vm633_vm14, %v2177_v55, %v630_v20  ;;  %v2809_v20 = vld [vmem:[%s3135_s7] ss:$0 sm:$0xff] }
 0x7e5   :  { %vm870_vm3 = vmor %vm868_vm15, %vm869_vm12  ;;  %v639_v38 = vsel %vm636_vm4, %v638_v36, %v634_v31  ;;  %v2838_v36 = vld [vmem:[%s3139_s11 + $0x28] sm:$0xff]  ;;  %vm1052_vm15 = vcmask 523264  }
 0x7e6   :  { %v865_v62 = vsub.f32 1.0, %v864_v60  ;;  %v640_v47 = vmul.f32 %v2711_v33, %v639_v38  ;;  %v2849_v38 = vld [vmem:[%s3139_s11 + $0x18] sm:$0xff] }
 0x7e8   :  { %v866_v15 = vmul.f32 %v2179_v57, %v865_v62  ;;  %v2784_v62 = vld [vmem:[%s3137_s9 + $0x18] sm:$0xff] }
 0x7ea   :  { %v867_v27 = vadd.f32 %v2179_v57, %v866_v15 }
 0x7ec   :  { %v871_v37 = vsel %vm870_vm3, %v2179_v57, %v867_v27 }
 0x7ed   :  { %v704_v56 = vpop.xlane.xlu1 %703  ;;  %v876_v41 = vsel %vm873_vm5, %v875_v39, %v871_v37  ;;  %v2843_v37 = vld [vmem:[%s3139_s11 + $0x20] sm:$0xff]  ;;  %v2855_v39 = vld [vmem:[%s3139_s11 + $0x10] sm:$0xff] }
 0x7ee   :  { %2180 = vrcp.f32 %v704_v56  ;;  %v716_v11 = vand.u32 2147483648, %v704_v56  ;;  %v714_v18 = vand.u32 2147483647, %v704_v56  ;;  %vm710_vm9 = vweird.f32 %v704_v56 }
 0x7ef   :  { %v2743_v58 = vpop.permute.xlu0 %799  ;;  %v877_v49 = vmul.f32 %v2715_v43, %v876_v41  ;;  %v2867_v41 = vld [vmem:[%s3139_s11] sm:$0xff] }
 0x7f0   :  { %v2745_v59 = vpop.xlane.xlu2 %782  ;;  %v717_v25 = vor.u32 1.1754944e-38, %v716_v11  ;;  %vm715_vm13 = vcmp.eq.f32.partialorder %v714_v18, 8.507059e+37 }
 0x7f1   :  { %2182 = vrcp.f32 %v2745_v59  ;;  %v795_v42 = vand.u32 2147483648, %v2745_v59  ;;  %vm789_vm8 = vweird.f32 %v2745_v59 }
 0x7f3   :  { %v796_v50 = vor.u32 1.1754944e-38, %v795_v42  ;;  %v2871_v42 = vld [vmem:[#allocation8] ss:$0 sm:$0xff] }
 0x7f4   :  { %v2181_v61 = vpop.eup %2180 }
 0x7f5   :  { %v706_v63 = vmul.f32 %v2181_v61, %v704_v56  ;;  %vm711_vm7 = vweird.f32 %v2181_v61 }
 0x7f6   :  { %vm712_vm11 = vmor %vm710_vm9, %vm711_vm7 }
 0x7f7   :  { %v2748_v0 = vpop.eup %2182  ;;  %v707_v8 = vsub.f32 1.0, %v706_v63  ;;  %v879_v19 = vpop.permute.xlu0 %878  ;;  %v2796_v63 = vld [vmem:[%s3137_s9 + $0x8] sm:$0xff] }
 0x7f8   :  { %v785_v13 = vmul.f32 %v2748_v0, %v2745_v59  ;;  %v721_v14 = vpop.permute.xlu2 %720  ;;  %vm790_vm7 = vweird.f32 %v2748_v0 }
 0x7f9   :  { %v708_v16 = vmul.f32 %v2181_v61, %v707_v8  ;;  %741 = vmatpush.msra.mxu1 %v721_v14  ;;  %vm791_vm9 = vmor %vm789_vm8, %vm790_vm7 }
 0x7fa   :  { %v786_v22 = vsub.f32 1.0, %v785_v13 }
 0x7fb   :  { %899 = vmatpush.msrb.mxu1 %v879_v19  ;;  %v709_v10 = vadd.f32 %v2181_v61, %v708_v16 }
 0x7fc   :  { %v787_v34 = vmul.f32 %v2748_v0, %v786_v22 }
 0x7fd   :  { %v713_v28 = vsel %vm712_vm11, %v2181_v61, %v709_v10 }
 0x7fe   :  { %v718_v30 = vsel %vm715_vm13, %v717_v25, %v713_v28  ;;  %v788_v40 = vadd.f32 %v2748_v0, %v787_v34  ;;  %v2826_v34 = vld [vmem:[%s3139_s11 + $0x38] sm:$0xff] }
 0x7ff   :  { %v719_v35 = vmul.f32 %v2719_v44, %v718_v30  ;;  %v793_v44 = vand.u32 2147483647, %v2745_v59  ;;  %1067 = vmatpush.msrb.mxu2 %v2826_v34 }
 0x801   :  { %2071 = vmatmul.msk.f32.vlgmr.msra.gmra.mxu1 %vm260_vm2, %v719_v35  ;;  %vm794_vm10 = vcmp.eq.f32.partialorder %v793_v44, 8.507059e+37  ;;  %v2832_v35 = vld [vmem:[%s3139_s11 + $0x30] sm:$0xff] }
 0x802   :  { %1150 = vmatpush.msra.mxu1 %v2558_v3  ;;  %v792_v3 = vsel %vm791_vm9, %v2748_v0, %v788_v40  ;;  %v2801_v0 = vld [vmem:[%s3137_s9] sm:$0xff]  ;;  %1068 = vmatpush.msrb.mxu2 %v2832_v35  ;;  %v2861_v40 = vld [vmem:[%s3139_s11 + $0x8] sm:$0xff] }
 0x804   :  { %1151 = vmatpush.msra.mxu1 %v2563_v4  ;;  %v797_v4 = vsel %vm794_vm10, %v796_v50, %v792_v3  ;;  %1069 = vmatpush.msrb.mxu2 %v2838_v36 }
 0x805   :  { %v642_v45 = vpop.permute.xlu1 %641  ;;  %v798_v33 = vmul.f32 %v2723_v46, %v797_v4 }
 0x806   :  { %662 = vmatpush.msra.mxu0 %v642_v45  ;;  %1152 = vmatpush.msra.mxu1 %v2573_v5  ;;  %v2449_v5 = vmov 32.0  }
 0x807   :  { %2068 = vmatmul.msk.f32.vlgmr.msra.gmra.mxu0 %vm260_vm2, %v640_v47  ;;  %2184 = vrcp.f32 %v2449_v5  ;;  %1070 = vmatpush.msrb.mxu2 %v2843_v37 }
 0x808   :  { %820 = vmatpush.msrb.mxu0 %v2743_v58  ;;  %1153 = vmatpush.msra.mxu1 %v2580_v6 }
 0x809   :  { %2077 = vmatmul.msk.f32.vlgmr.msrb.gmra.mxu1 %vm260_vm2, %v877_v49  ;;  %1071 = vmatpush.msrb.mxu2 %v2849_v38 }
 0x80a   :  { %1023 = vmatpush.msra.mxu0 %v2784_v62 }
 0x80b   :  { %1072 = vmatpush.msrb.mxu2 %v2855_v39 }
 0x80d   :  { %v2185_v52 = vpop.eup %2184  ;;  %1073 = vmatpush.msrb.mxu2 %v2861_v40 }
 0x80e   :  { %v957_v53 = vmul.f32 32.0, %v2185_v52  ;;  %vm961_vm11 = vweird.f32 %v2185_v52 }
 0x80f   :  { %2074 = vmatmul.msk.f32.vlgmr.msrb.gmra.mxu0 %vm260_vm2, %v798_v33  ;;  %1074 = vmatpush.msrb.mxu2 %v2867_v41 }
 0x810   :  { %v958_v54 = vsub.f32 1.0, %v957_v53 }
 0x812   :  { %v959_v55 = vmul.f32 %v2185_v52, %v958_v54 }
 0x814   :  { %v960_v43 = vadd.f32 %v2185_v52, %v959_v55 }
 0x816   :  { %v2773_v56 = vsel %vm961_vm11, %v2185_v52, %v960_v43 }
 0x843   :  { %v952_v57 = vpop.xlane.xlu1 %951 }
 0x844   :  { %v963_v6 = vmul.f32 %v2773_v56, %v952_v57 }
 0x846   :  { %v965_v17 = vsub.f32 %v2739_v51, %v963_v6  ;;  %v2790_v51 = vld [vmem:[%s3137_s9 + $0x10] sm:$0xff]  ;;  %v2878_v6 = vld [vmem:[#allocation10] ss:$0 sm:$0xff] }
 0x847   :  { %1024 = vmatpush.msra.mxu0 %v2790_v51 }
 0x848   :  { %v967_v58 = vmul.f32 %v965_v17, %v965_v17 }
 0x849   :  { %1025 = vmatpush.msra.mxu0 %v2796_v63 }
 0x84a   :  { %v969_v46 = vsel %vm227_vm1, %v967_v58, 0.0 }
 0x84b   :  { %970 = vadd.xlane.f32.xlu2 %v969_v46  ;;  %1026 = vmatpush.msra.mxu0 %v2801_v0 }
 0x87e   :  { %v743_v59 = vpop.f32.mrf.mxu1 }
 0x87f   :  { %905 = vrot.lane.b32.xlu0 %v743_v59, %s2430_s27 }
 0x884   :  { %v664_v60 = vpop.f32.mrf.mxu0 }
 0x886   :  { %v901_v61 = vpop.f32.mrf.mxu1 }
 0x88c   :  { %v822_v9 = vpop.f32.mrf.mxu0 }
 0x88d   :  { %909 = vrot.lane.b32.xlu0 %v822_v9, %s2447_s17 }
 0x895   :  { %913 = vrot.lane.b32.xlu0 %v901_v61, %s2448_s18 }
 0x8be   :  { %v971_v7 = vpop.xlane.xlu2 %970 }
 0x8bf   :  { %v975_v8 = vmul.f32 %v971_v7, %v2773_v56 }
 0x8c1   :  { %v977_v11 = vadd.f32 1e-12, %v975_v8 }
 0x8c3   :  { %2186 = vrsqrt.f32 %v977_v11  ;;  %vm985_vm13 = vweird.f32 %v977_v11 }
 0x8c9   :  { %v2187_v13 = vpop.eup %2186 }
 0x8ca   :  { %v980_v14 = vmul.f32 %v2187_v13, %v977_v11  ;;  %vm986_vm12 = vweird.f32 %v2187_v13 }
 0x8cb   :  { %vm987_vm14 = vmor %vm985_vm13, %vm986_vm12 }
 0x8cc   :  { %v981_v15 = vmul.f32 %v2187_v13, %v980_v14 }
 0x8ce   :  { %v982_v16 = vmul.f32 0.5, %v981_v15 }
 0x8d0   :  { %v983_v18 = vsub.f32 1.5, %v982_v16 }
 0x8d2   :  { %v984_v19 = vmul.f32 %v2187_v13, %v983_v18 }
 0x8d4   :  { %v988_v10 = vsel %vm987_vm14, %v2187_v13, %v984_v19 }
 0x8d5   :  { %v999_v22 = vmul.f32 %v988_v10, %v965_v17 }
 0x8d7   :  { %v1001_v24 = vmul.f32 %v2809_v20, %v999_v22 }
 0x8d9   :  { %v1003_v25 = vadd.f32 %v2814_v23, %v1001_v24 }
 0x8db   :  { %2080 = vmatmul.msk.f32.vlgmr.msra.gmra.mxu0 %vm227_vm1, %v1003_v25 }
 0x8f1   :  { %v906_v27 = vpop.permute.xlu0 %905 }
 0x8f2   :  { %v916_v29 = vsel %vm260_vm2, %v664_v60, %v906_v27 }
 0x8ff   :  { %v910_v28 = vpop.permute.xlu0 %909 }
 0x900   :  { %v917_v30 = vsel %vm197_vm0, %v916_v29, %v910_v28 }
 0x907   :  { %v914_v31 = vpop.permute.xlu0 %913 }
 0x908   :  { %v918_v32 = vsel %vm587_vm6, %v917_v30, %v914_v31 }
 0x909   :  { %2079 = vmatmul.msk.f32.gmra.mxu3 %vm227_vm1, %v918_v32 }
 0x958   :  { %v1028_v44 = vpop.f32.mrf.mxu0 }
 0x959   :  { %v1029_v45 = vadd.f32 %v2871_v42, %v1028_v44 }
 0x95b   :  { %v1036_v47 = vmul.f32 0.044715, %v1029_v45  ;;  %v1034_v5 = vmul.f32 0.5, %v1029_v45 }
 0x95d   :  { %v1038_v3 = vmul.f32 %v1036_v47, %v1029_v45 }
 0x95f   :  { %v1040_v49 = vmul.f32 %v1038_v3, %v1029_v45 }
 0x961   :  { %v1042_v50 = vadd.f32 %v1040_v49, %v1029_v45 }
 0x963   :  { %v1044_v4 = vmul.f32 0.7978846, %v1042_v50 }
 0x965   :  { %2188 = vtanh.f32 %v1044_v4 }
 0x96b   :  { %v2189_v33 = vpop.eup %2188 }
 0x96c   :  { %v1048_v52 = vadd.f32 1.0, %v2189_v33 }
 0x96e   :  { %v1050_v53 = vmul.f32 %v1048_v52, %v1034_v5  ;;  %v2896_v52 = vld [vmem:[#allocation11] ss:$0 sm:$0xff] }
 0x970   :  { %2082 = vmatmul.msk.f32.vlgmr.msrb.gmra.mxu2 %vm1052_vm15, %v1050_v53 }
 0x98c   :  { %v945_v54 = vpop.f32.mrf.mxu3 }
 0x98d   :  { %v946_v55 = vadd.f32 %v2735_v48, %v945_v54 }
 0x98f   :  { %v949_v43 = vadd.f32 %v946_v55, %v2620_v26 }
 0x991   :  { %v953_v57 = vsel %vm227_vm1, %v949_v43, 0.0 }
 0x992   :  { %954 = vadd.xlane.f32.xlu0 %v953_v57 }
 0x9f3   :  { %v1076_v17 = vpop.f32.mrf.mxu2 }
 0x9f4   :  { %v1077_v58 = vadd.f32 %v2878_v6, %v1076_v17 }
 0x9f6   :  { %v1082_v46 = vadd.f32 %v1077_v58, %v1003_v25 }
 0x9f8   :  { %v1084_v59 = vsel %vm227_vm1, %v1082_v46, 0.0 }
 0x9f9   :  { %1085 = vadd.xlane.f32.xlu2 %v1084_v59 }
 0xa05   :  { %v955_v60 = vpop.xlane.xlu0 %954 }
 0xa06   :  { %v964_v9 = vmul.f32 %v2773_v56, %v955_v60 }
 0xa08   :  { %v966_v61 = vsub.f32 %v949_v43, %v964_v9 }
 0xa0a   :  { %v968_v7 = vmul.f32 %v966_v61, %v966_v61 }
 0xa0c   :  { %v972_v48 = vsel %vm227_vm1, %v968_v7, 0.0 }
 0xa0d   :  { %973 = vadd.xlane.f32.xlu1 %v972_v48 }
 0xa6c   :  { %v1086_v26 = vpop.xlane.xlu2 %1085 }
 0xa6d   :  { %v1090_v8 = vmul.f32 %v1086_v26, %v2773_v56  ;;  %v2242_v26 = vld [vmem:[%s3132_s4] ss:$0 sm:$0xff] }
 0xa6f   :  { %v1092_v11 = vsub.f32 %v1082_v46, %v1090_v8 }
 0xa71   :  { %v1094_v13 = vmul.f32 %v1092_v11, %v1092_v11 }
 0xa73   :  { %v1096_v14 = vsel %vm227_vm1, %v1094_v13, 0.0 }
 0xa74   :  { %1097 = vadd.xlane.f32.xlu1 %v1096_v14 }
 0xa80   :  { %v974_v15 = vpop.xlane.xlu1 %973 }
 0xa81   :  { %v976_v16 = vmul.f32 %v974_v15, %v2773_v56 }
 0xa83   :  { %v978_v18 = vadd.f32 1e-12, %v976_v16 }
 0xa85   :  { %2190 = vrsqrt.f32 %v978_v18  ;;  %vm995_vm4 = vweird.f32 %v978_v18 }
 0xa8b   :  { %v2191_v19 = vpop.eup %2190 }
 0xa8c   :  { %v990_v10 = vmul.f32 %v2191_v19, %v978_v18  ;;  %vm996_vm3 = vweird.f32 %v2191_v19 }
 0xa8d   :  { %vm997_vm5 = vmor %vm995_vm4, %vm996_vm3 }
 0xa8e   :  { %v991_v22 = vmul.f32 %v2191_v19, %v990_v10 }
 0xa90   :  { %v992_v24 = vmul.f32 0.5, %v991_v22 }
 0xa92   :  { %v993_v25 = vsub.f32 1.5, %v992_v24 }
 0xa94   :  { %v994_v27 = vmul.f32 %v2191_v19, %v993_v25 }
 0xa96   :  { %v998_v28 = vsel %vm997_vm5, %v2191_v19, %v994_v27 }
 0xa97   :  { %v1000_v29 = vmul.f32 %v998_v28, %v966_v61 }
 0xa99   :  { %v1002_v30 = vmul.f32 %v2809_v20, %v1000_v29  ;;  %v2894_v20 = vld [vmem:[%s3141_s13] ss:$0 sm:$0xff] }
 0xa9b   :  { %v1004_v31 = vadd.f32 %v2814_v23, %v1002_v30 }
 0xa9d   :  { %2081 = vmatmul.msk.f32.gmra.mxu0 %vm227_vm1, %v1004_v31 }
 0xae7   :  { %v1098_v32 = vpop.xlane.xlu1 %1097 }
 0xae8   :  { %v1102_v44 = vmul.f32 %v1098_v32, %v2773_v56 }
 0xaea   :  { %v1104_v45 = vadd.f32 1e-12, %v1102_v44 }
 0xaec   :  { %2192 = vrsqrt.f32 %v1104_v45  ;;  %vm1112_vm8 = vweird.f32 %v1104_v45 }
 0xaf2   :  { %v2193_v47 = vpop.eup %2192 }
 0xaf3   :  { %v1107_v3 = vmul.f32 %v2193_v47, %v1104_v45  ;;  %vm1113_vm7 = vweird.f32 %v2193_v47 }
 0xaf4   :  { %vm1114_vm9 = vmor %vm1112_vm8, %vm1113_vm7 }
 0xaf5   :  { %v1108_v49 = vmul.f32 %v2193_v47, %v1107_v3 }
 0xaf7   :  { %v1109_v50 = vmul.f32 0.5, %v1108_v49 }
 0xaf9   :  { %v1110_v4 = vsub.f32 1.5, %v1109_v50 }
 0xafb   :  { %v1111_v33 = vmul.f32 %v2193_v47, %v1110_v4 }
 0xafd   :  { %v1115_v23 = vsel %vm1114_vm9, %v2193_v47, %v1111_v33 }
 0xafe   :  { %v1126_v5 = vmul.f32 %v1115_v23, %v1092_v11 }
 0xb00   :  { %v1128_v53 = vmul.f32 %v2894_v20, %v1126_v5 }
 0xb02   :  { %v2900_v54 = vadd.f32 %v2896_v52, %v1128_v53 }
 0xb04   :  { %2084 = vmatmul.msk.f32.vlgmr.msra.gmra.mxu1 %vm227_vm1, %v2900_v54 }
 0xb1a   :  { %v1031_v55 = vpop.f32.mrf.mxu0 }
 0xb1b   :  { %v1032_v43 = vadd.f32 %v2871_v42, %v1031_v55 }
 0xb1d   :  { %v1037_v57 = vmul.f32 0.044715, %v1032_v43  ;;  %v1035_v9 = vmul.f32 0.5, %v1032_v43 }
 0xb1f   :  { %v1039_v17 = vmul.f32 %v1037_v57, %v1032_v43 }
 0xb21   :  { %v1041_v58 = vmul.f32 %v1039_v17, %v1032_v43 }
 0xb23   :  { %v1043_v46 = vadd.f32 %v1041_v58, %v1032_v43 }
 0xb25   :  { %v1045_v59 = vmul.f32 0.7978846, %v1043_v46 }
 0xb27   :  { %2194 = vtanh.f32 %v1045_v59 }
 0xb2d   :  { %v2195_v60 = vpop.eup %2194 }
 0xb2e   :  { %v1049_v61 = vadd.f32 1.0, %v2195_v60 }
 0xb30   :  { %v1051_v7 = vmul.f32 %v1049_v61, %v1035_v9 }
 0xb32   :  { %2083 = vmatmul.msk.f32.gmra.mxu2 %vm1052_vm15, %v1051_v7 }
 0xb81   :  { %v1155_v48 = vpop.f32.mrf.mxu1 }
 0xb82   :  { %v2909_v8 = vadd.f32 %v2242_v26, %v1155_v48 }
 0xb84   :  { %1162 = vrot.lane.b32.xlu2 %v2909_v8, %s2437_s2 }
 0xb8c   :  { %1241 = vrot.lane.b32.xlu2 %v2909_v8, %s2436_s3 }
 0xb94   :  { %1320 = vrot.lane.b32.xlu2 %v2909_v8, %s2443_s16 }
 0xb9c   :  { %1399 = vrot.lane.b32.xlu2 %v2909_v8, %s2440_s6 }
 0xba4   :  { %1318 = vrot.lane.b32.xlu2 %v2909_v8, %s2444_s1 }
 0xbb5   :  { %v1079_v42 = vpop.f32.mrf.mxu2 }
 0xbb6   :  { %v1080_v11 = vadd.f32 %v2878_v6, %v1079_v42 }
 0xbb8   :  { %v1083_v13 = vadd.f32 %v1080_v11, %v1004_v31 }
 0xbba   :  { %v1087_v14 = vsel %vm227_vm1, %v1083_v13, 0.0 }
 0xbbb   :  { %1088 = vadd.xlane.f32.xlu1 %v1087_v14 }
 0xbde   :  { %v1163_v15 = vpop.permute.xlu2 %1162 }
 0xbdf   :  { %2086 = vmatpush.xpose.msk.msrb.mxu3 %vm260_vm2, %v1163_v15 }
 0xbe2   :  { %2087 = vmatmul.msk.f32.vlgmr.msrb.gmra.mxu3 %vm260_vm2, %v2909_v8 }
 0xbe6   :  { %v1242_v16 = vpop.permute.xlu2 %1241 }
 0xbe7   :  { %2089 = vmatpush.xpose.msk.msrb.mxu1 %vm260_vm2, %v1242_v16 }
 0xbee   :  { %v1321_v18 = vpop.permute.xlu2 %1320 }
 0xbf6   :  { %v1400_v19 = vpop.permute.xlu2 %1399 }
 0xbf7   :  { %2095 = vmatpush.xpose.msk.msra.mxu1 %vm260_vm2, %v1400_v19 }
 0xc2e   :  { %v1089_v10 = vpop.xlane.xlu1 %1088 }
 0xc2f   :  { %v1091_v6 = vmul.f32 %v1089_v10, %v2773_v56 }
 0xc31   :  { %v1093_v22 = vsub.f32 %v1083_v13, %v1091_v6  ;;  %v1319_v13 = vpop.permute.xlu2 %1318 }
 0xc33   :  { %v1095_v24 = vmul.f32 %v1093_v22, %v1093_v22 }
 0xc35   :  { %v1099_v25 = vsel %vm227_vm1, %v1095_v24, 0.0 }
 0xc36   :  { %1100 = vadd.xlane.f32.xlu1 %v1099_v25 }
 0xc4f   :  { %1239 = vrot.lane.b32.xlu1 %v2909_v8, %s2438_s25 }
 0xc65   :  { %v1185_v27 = vpop.f32.mrf.mxu3 }
 0xc66   :  { %v1188_v28 = vmul.f32 0.35355338, %v1185_v27 }
 0xc68   :  { %v1189_v29 = vsel %vm260_vm2, %v1188_v28, -inf }
 0xc69   :  { %1190 = vmax.xlane.f32.xlu0 %v1189_v29 }
 0xc7d   :  { %1213 = vrot.lane.b32.xlu0 %v2909_v8, %s2442_s30 }
 0xc85   :  { %1397 = vrot.lane.b32.xlu0 %v2909_v8, %s2441_s29 }
 0xca9   :  { %v1101_v30 = vpop.xlane.xlu1 %1100 }
 0xcaa   :  { %v1103_v31 = vmul.f32 %v1101_v30, %v2773_v56 }
 0xcac   :  { %v1105_v32 = vadd.f32 1e-12, %v1103_v31 }
 0xcae   :  { %2196 = vrsqrt.f32 %v1105_v32  ;;  %vm1122_vm11 = vweird.f32 %v1105_v32 }
 0xcb4   :  { %v2197_v44 = vpop.eup %2196 }
 0xcb5   :  { %v1117_v45 = vmul.f32 %v2197_v44, %v1105_v32  ;;  %vm1123_vm10 = vweird.f32 %v2197_v44 }
 0xcb6   :  { %vm1124_vm12 = vmor %vm1122_vm11, %vm1123_vm10 }
 0xcb7   :  { %v1118_v47 = vmul.f32 %v2197_v44, %v1117_v45 }
 0xcb9   :  { %v1119_v3 = vmul.f32 0.5, %v1118_v47 }
 0xcbb   :  { %v1120_v49 = vsub.f32 1.5, %v1119_v3 }
 0xcbd   :  { %v1121_v50 = vmul.f32 %v2197_v44, %v1120_v49 }
 0xcbf   :  { %v1125_v4 = vsel %vm1124_vm12, %v2197_v44, %v1121_v50 }
 0xcc0   :  { %v1127_v33 = vmul.f32 %v1125_v4, %v1093_v22 }
 0xcc1   :  { %v1240_v53 = vpop.permute.xlu1 %1239 }
 0xcc2   :  { %v1129_v23 = vmul.f32 %v2894_v20, %v1127_v33 }
 0xcc4   :  { %v2940_v5 = vadd.f32 %v2896_v52, %v1129_v23 }
 0xcc6   :  { %2085 = vmatmul.msk.f32.gmra.mxu1 %vm227_vm1, %v2940_v5 }
 0xcce   :  { %2090 = vmatmul.msk.f32.vlgmr.msrb.gmra.mxu1 %vm260_vm2, %v1240_v53 }
 0xcdc   :  { %v1191_v55 = vpop.xlane.xlu0 %1190 }
 0xcdd   :  { %v1192_v20 = vsub.f32 %v1188_v28, %v1191_v55 }
 0xcdf   :  { %v1193_v52 = vmul.f32 1.442695, %v1192_v20 }
 0xce1   :  { %2198 = vpow2.f32 %v1193_v52 }
 0xce7   :  { %v2199_v46 = vpop.eup %2198 }
 0xce8   :  { %v1195_v59 = vsel %vm260_vm2, %v2199_v46, 0.0 }
 0xcef   :  { %v1214_v43 = vpop.permute.xlu0 %1213 }
 0xcf0   :  { %1234 = vmatpush.msrb.mxu0 %v1214_v43 }
 0xcf2   :  { %2092 = vmatpush.xpose.msk.msra.mxu0 %vm260_vm2, %v1321_v18 }
 0xcf7   :  { %v1398_v57 = vpop.permute.xlu0 %1397 }
 0xcf8   :  { %2096 = vmatmul.msk.f32.vlgmr.msra.gmra.mxu1 %vm260_vm2, %v1398_v57 }
 0xd43   :  { %v1158_v17 = vpop.f32.mrf.mxu1 }
 0xd44   :  { %v2947_v58 = vadd.f32 %v2242_v26, %v1158_v17 }
 0xd46   :  { %1569 = vrot.lane.b32.xlu0 %v2947_v58, %s2438_s25  ;;  %1571 = vrot.lane.b32.xlu1 %v2947_v58, %s2436_s3 }
 0xd47   :  { %1492 = vrot.lane.b32.xlu2 %v2947_v58, %s2437_s2 }
 0xd4b   :  { %v1264_v60 = vpop.f32.mrf.mxu1 }
 0xd4c   :  { %v1267_v48 = vmul.f32 0.35355338, %v1264_v60 }
 0xd4e   :  { %1648 = vrot.lane.b32.xlu0 %v2947_v58, %s2444_s1  ;;  %v1268_v26 = vsel %vm260_vm2, %v1267_v48, -inf }
 0xd4f   :  { %1650 = vrot.lane.b32.xlu2 %v2947_v58, %s2443_s16 }
 0xd57   :  { %1727 = vrot.lane.b32.xlu2 %v2947_v58, %s2441_s29 }
 0xd70   :  { %1196 = vadd.xlane.f32.xlu1 %v1195_v59 }
 0xd75   :  { %v1422_v9 = vpop.f32.mrf.mxu1 }
 0xd76   :  { %v2962_v61 = vmul.f32 0.35355338, %v1422_v9 }
 0xd78   :  { %v1426_v7 = vsel %vm260_vm2, %v2962_v61, -inf }
 0xd80   :  { %1427 = vmax.xlane.f32.xlu2 %v1426_v7 }
 0xd89   :  { %1729 = vrot.lane.b32.xlu1 %v2947_v58, %s2440_s6 }
 0xda1   :  { %v1493_v16 = vpop.permute.xlu2 %1492 }
 0xda9   :  { %v1651_v28 = vpop.permute.xlu2 %1650 }
 0xdb1   :  { %v1728_v32 = vpop.permute.xlu2 %1727 }
 0xdb3   :  { %1269 = vmax.xlane.f32.xlu1 %v1268_v26 }
 0xdb8   :  { %v1572_v42 = vpop.permute.xlu1 %1571  ;;  %v1570_v11 = vpop.permute.xlu0 %1569 }
 0xdb9   :  { %2101 = vmatpush.xpose.msk.msrb.mxu1 %vm260_vm2, %v1572_v42 }
 0xdbc   :  { %2102 = vmatmul.msk.f32.vlgmr.msrb.gmra.mxu1 %vm260_vm2, %v1570_v11 }
 0xde3   :  { %v1197_v14 = vpop.xlane.xlu1 %1196 }
 0xde4   :  { %2200 = vrcp.f32 %v1197_v14  ;;  %v1209_v10 = vand.u32 2147483648, %v1197_v14  ;;  %v1207_v22 = vand.u32 2147483647, %v1197_v14  ;;  %vm1203_vm14 = vweird.f32 %v1197_v14 }
 0xde6   :  { %v1210_v25 = vor.u32 1.1754944e-38, %v1209_v10  ;;  %vm1208_vm4 = vcmp.eq.f32.partialorder %v1207_v22, 8.507059e+37 }
 0xdea   :  { %v2201_v15 = vpop.eup %2200 }
 0xdeb   :  { %v1199_v18 = vmul.f32 %v2201_v15, %v1197_v14  ;;  %vm1204_vm13 = vweird.f32 %v2201_v15 }
 0xdec   :  { %vm1205_vm3 = vmor %vm1203_vm14, %vm1204_vm13 }
 0xded   :  { %v1200_v19 = vsub.f32 1.0, %v1199_v18 }
 0xdef   :  { %v1201_v6 = vmul.f32 %v2201_v15, %v1200_v19 }
 0xdf1   :  { %v1202_v24 = vadd.f32 %v2201_v15, %v1201_v6 }
 0xdf3   :  { %v1206_v27 = vsel %vm1205_vm3, %v2201_v15, %v1202_v24 }
 0xdf4   :  { %v1211_v29 = vsel %vm1208_vm4, %v1210_v25, %v1206_v27 }
 0xdf5   :  { %v1212_v30 = vmul.f32 %v2199_v46, %v1211_v29 }
 0xdf7   :  { %2088 = vmatmul.msk.f32.vlgmr.msrb.gmra.mxu0 %vm260_vm2, %v1212_v30 }
 0xdf8   :  { %2098 = vmatpush.xpose.msk.msrb.mxu0 %vm260_vm2, %v1493_v16 }
 0xdfb   :  { %v1730_v31 = vpop.permute.xlu1 %1729 }
 0xdfc   :  { %2107 = vmatpush.xpose.msk.msra.mxu1 %vm260_vm2, %v1730_v31 }
 0xdff   :  { %2093 = vmatmul.msk.f32.vlgmr.msra.gmra.mxu0 %vm260_vm2, %v1319_v13  ;;  %2108 = vmatmul.msk.f32.vlgmr.msra.gmra.mxu1 %vm260_vm2, %v1728_v32 }
 0xe00   :  { %1961 = vmatpush.msrb.mxu1 %v2826_v34  ;;  %2104 = vmatpush.xpose.msk.msra.mxu0 %vm260_vm2, %v1651_v28  ;;  %v1649_v34 = vpop.permute.xlu0 %1648 }
 0xe02   :  { %1962 = vmatpush.msrb.mxu1 %v2832_v35 }
 0xe04   :  { %1963 = vmatpush.msrb.mxu1 %v2838_v36 }
 0xe06   :  { %1964 = vmatpush.msrb.mxu1 %v2843_v37 }
 0xe07   :  { %2099 = vmatmul.msk.f32.vlgmr.msrb.gmra.mxu0 %vm260_vm2, %v2947_v58 }
 0xe08   :  { %1965 = vmatpush.msrb.mxu1 %v2849_v38  ;;  %1839 = vmatpush.msrb.mxu0 %v2681_v1 }
 0xe0a   :  { %1966 = vmatpush.msrb.mxu1 %v2855_v39  ;;  %1840 = vmatpush.msrb.mxu0 %v2686_v2 }
 0xe0c   :  { %1967 = vmatpush.msrb.mxu1 %v2861_v40  ;;  %1841 = vmatpush.msrb.mxu0 %v2697_v21 }
 0xe0e   :  { %1968 = vmatpush.msrb.mxu1 %v2867_v41  ;;  %1842 = vmatpush.msrb.mxu0 %v2703_v12  ;;  %v1428_v12 = vpop.xlane.xlu2 %1427 }
 0xe0f   :  { %2105 = vmatmul.msk.f32.vlgmr.msra.gmra.mxu0 %vm260_vm2, %v1649_v34  ;;  %v1429_v3 = vsub.f32 %v2962_v61, %v1428_v12 }
 0xe11   :  { %v1430_v33 = vmul.f32 1.442695, %v1429_v3 }
 0xe26   :  { %v1270_v1 = vpop.xlane.xlu1 %1269 }
 0xe27   :  { %v1271_v2 = vsub.f32 %v1267_v48, %v1270_v1 }
 0xe29   :  { %v1272_v39 = vmul.f32 1.442695, %v1271_v2 }
 0xe2b   :  { %2202 = vpow2.f32 %v1272_v39 }
 0xe2c   :  { %2204 = vpow2.f32 %v1430_v33 }
 0xe31   :  { %v2999_v41 = vpop.eup %2202 }
 0xe32   :  { %v1274_v50 = vsel %vm260_vm2, %v2999_v41, 0.0  ;;  %v3006_v55 = vpop.eup %2204 }
 0xe33   :  { %v1432_v43 = vsel %vm260_vm2, %v3006_v55, 0.0 }
 0xe39   :  { %v1594_v35 = vpop.f32.mrf.mxu1 }
 0xe3a   :  { %v1597_v36 = vmul.f32 0.35355338, %v1594_v35 }
 0xe3c   :  { %v1598_v37 = vsel %vm260_vm2, %v1597_v36, -inf }
 0xe3d   :  { %1599 = vmax.xlane.f32.xlu0 %v1598_v37 }
 0xe74   :  { %v2993_v38 = vpop.f32.mrf.mxu0 }
 0xe7c   :  { %v1343_v40 = vpop.f32.mrf.mxu0  ;;  %v1752_v4 = vpop.f32.mrf.mxu1 }
 0xe7d   :  { %v2995_v44 = vmul.f32 0.35355338, %v1343_v40  ;;  %v1755_v23 = vmul.f32 0.35355338, %v1752_v4 }
 0xe7f   :  { %v1347_v21 = vsel %vm260_vm2, %v2995_v44, -inf  ;;  %v1756_v53 = vsel %vm260_vm2, %v1755_v23, -inf }
 0xe80   :  { %1348 = vmax.xlane.f32.xlu0 %v1347_v21 }
 0xe84   :  { %v1515_v45 = vpop.f32.mrf.mxu0 }
 0xe85   :  { %v1518_v47 = vmul.f32 0.35355338, %v1515_v45 }
 0xe87   :  { %v1519_v49 = vsel %vm260_vm2, %v1518_v47, -inf }
 0xe88   :  { %1520 = vmax.xlane.f32.xlu1 %v1519_v49  ;;  %1275 = vadd.xlane.f32.xlu0 %v1274_v50 }
 0xe8c   :  { %v1673_v10 = vpop.f32.mrf.mxu0 }
 0xe8d   :  { %v1676_v22 = vmul.f32 0.35355338, %v1673_v10 }
 0xe8f   :  { %v1677_v25 = vsel %vm260_vm2, %v1676_v22, -inf }
 0xe90   :  { %1757 = vmax.xlane.f32.xlu1 %v1756_v53 }
 0xe98   :  { %1433 = vadd.xlane.f32.xlu1 %v1432_v43 }
 0xe9c   :  { %1371 = vrot.lane.b32.xlu0 %v2909_v8, %s2445_s12 }
 0xeb0   :  { %v1600_v57 = vpop.xlane.xlu0 %1599 }
 0xeb1   :  { %v1601_v17 = vsub.f32 %v1597_v36, %v1600_v57  ;;  %1292 = vrot.lane.b32.xlu1 %v2909_v8, %s2439_s28 }
 0xeb3   :  { %v1602_v20 = vmul.f32 1.442695, %v1601_v17 }
 0xeb5   :  { %2206 = vpow2.f32 %v1602_v20 }
 0xeb9   :  { %1543 = vrot.lane.b32.xlu1 %v2947_v58, %s2442_s30  ;;  %s2034_s30 = sshll.u32 %s3143_s15, 4  ;;  %s2035_s30 = int_to_ptr.hbm [resolvable:$true] %s2034_s30 }
 0xebb   :  { %v3016_v52 = vpop.eup %2206 }
 0xebc   :  { %v1604_v46 = vsel %vm260_vm2, %v3016_v52, 0.0 }
 0xebd   :  { %1605 = vadd.xlane.f32.xlu2 %v1604_v46 }
 0xec1   :  { %1701 = vrot.lane.b32.xlu1 %v2947_v58, %s2445_s12 }
 0xef3   :  { %v1349_v59 = vpop.xlane.xlu0 %1348 }
 0xef4   :  { %v1350_v1 = vsub.f32 %v2995_v44, %v1349_v59 }
 0xef6   :  { %v1351_v2 = vmul.f32 1.442695, %v1350_v1 }
 0xefb   :  { %v1521_v60 = vpop.xlane.xlu1 %1520  ;;  %v1276_v7 = vpop.xlane.xlu0 %1275 }
 0xefc   :  { %v1522_v9 = vsub.f32 %v1518_v47, %v1521_v60  ;;  %v1288_v28 = vand.u32 2147483648, %v1276_v7  ;;  %vm1282_vm7 = vweird.f32 %v1276_v7  ;;  %v1286_v29 = vand.u32 2147483647, %v1276_v7 }
 0xefe   :  { %v1523_v61 = vmul.f32 1.442695, %v1522_v9  ;;  %v1289_v32 = vor.u32 1.1754944e-38, %v1288_v28  ;;  %vm1287_vm9 = vcmp.eq.f32.partialorder %v1286_v29, 8.507059e+37 }
 0xf00   :  { %2208 = vpow2.f32 %v1523_v61 }
 0xf01   :  { %2210 = vrcp.f32 %v1276_v7 }
 0xf03   :  { %v1758_v48 = vpop.xlane.xlu1 %1757 }
 0xf04   :  { %v1759_v26 = vsub.f32 %v1755_v23, %v1758_v48 }
 0xf06   :  { %v1760_v42 = vmul.f32 1.442695, %v1759_v26  ;;  %v3022_v11 = vpop.eup %2208 }
 0xf07   :  { %v1525_v13 = vsel %vm260_vm2, %v3022_v11, 0.0  ;;  %v2211_v14 = vpop.eup %2210 }
 0xf08   :  { %2212 = vpow2.f32 %v1760_v42  ;;  %1526 = vadd.xlane.f32.xlu0 %v1525_v13  ;;  %v1278_v15 = vmul.f32 %v2211_v14, %v1276_v7  ;;  %vm1283_vm5 = vweird.f32 %v2211_v14 }
 0xf09   :  { %vm1284_vm8 = vmor %vm1282_vm7, %vm1283_vm5  ;;  %2214 = vpow2.f32 %v1351_v2 }
 0xf0a   :  { %v1279_v6 = vsub.f32 1.0, %v1278_v15 }
 0xf0b   :  { %v1434_v30 = vpop.xlane.xlu1 %1433 }
 0xf0c   :  { %v1280_v24 = vmul.f32 %v2211_v14, %v1279_v6  ;;  %2216 = vrcp.f32 %v1434_v30  ;;  %v1446_v44 = vand.u32 2147483648, %v1434_v30  ;;  %vm1440_vm11 = vweird.f32 %v1434_v30 }
 0xf0d   :  { %v1444_v49 = vand.u32 2147483647, %v1434_v30 }
 0xf0e   :  { %v3026_v16 = vpop.eup %2212  ;;  %v1372_v18 = vpop.permute.xlu0 %1371  ;;  %v1281_v27 = vadd.f32 %v2211_v14, %v1280_v24  ;;  %v1447_v23 = vor.u32 1.1754944e-38, %v1446_v44 }
 0xf0f   :  { %1392 = vmatpush.msra.mxu2 %v1372_v18  ;;  %v1762_v19 = vsel %vm260_vm2, %v3026_v16, 0.0  ;;  %v2215_v39 = vpop.eup %2214  ;;  %vm1445_vm13 = vcmp.eq.f32.partialorder %v1444_v49, 8.507059e+37 }
 0xf10   :  { %1763 = vadd.xlane.f32.xlu2 %v1762_v19  ;;  %v1285_v31 = vsel %vm1284_vm8, %v2211_v14, %v1281_v27  ;;  %v1353_v40 = vsel %vm260_vm2, %v2215_v39, 0.0 }
 0xf11   :  { %v1290_v34 = vsel %vm1287_vm9, %v1289_v32, %v1285_v31 }
 0xf12   :  { %v1291_v36 = vmul.f32 %v2999_v41, %v1290_v34  ;;  %v2217_v21 = vpop.eup %2216 }
 0xf13   :  { %v1436_v41 = vmul.f32 %v2217_v21, %v1434_v30  ;;  %vm1441_vm10 = vweird.f32 %v2217_v21 }
 0xf14   :  { %vm1442_vm12 = vmor %vm1440_vm11, %vm1441_vm10 }
 0xf15   :  { %v1437_v45 = vsub.f32 1.0, %v1436_v41 }
 0xf18   :  { %1678 = vmax.xlane.f32.xlu2 %v1677_v25 }
 0xf23   :  { %v1293_v35 = vpop.permute.xlu1 %1292 }
 0xf24   :  { %1313 = vmatpush.msra.mxu3 %v1293_v35 }
 0xf25   :  { %2091 = vmatmul.msk.f32.vlgmr.msra.gmra.mxu3 %vm260_vm2, %v1291_v36 }
 0xf2b   :  { %v1544_v37 = vpop.permute.xlu1 %1543 }
 0xf2c   :  { %1564 = vmatpush.msrb.mxu2 %v1544_v37 }
 0xf30   :  { %1450 = vrot.lane.b32.xlu2 %v2909_v8, %s2446_s14  ;;  %v3039_v12 = vpop.xlane.xlu2 %1605  ;;  %v1438_v8 = vmul.f32 %v2217_v21, %v1437_v45 }
 0xf32   :  { %v1439_v3 = vadd.f32 %v2217_v21, %v1438_v8 }
 0xf33   :  { %v1702_v28 = vpop.permute.xlu1 %1701 }
 0xf34   :  { %v1443_v33 = vsel %vm1442_vm12, %v2217_v21, %v1439_v3  ;;  %vm1612_vm12 = vweird.f32 %v3039_v12  ;;  %v1616_v21 = vand.u32 2147483647, %v3039_v12 }
 0xf35   :  { %v1448_v43 = vsel %vm1445_vm13, %v1447_v23, %v1443_v33 }
 0xf36   :  { %v1449_v17 = vmul.f32 %v3006_v55, %v1448_v43 }
 0xf59   :  { %1354 = vadd.xlane.f32.xlu2 %v1353_v40 }
 0xf71   :  { %1780 = vrot.lane.b32.xlu2 %v2947_v58, %s2446_s14 }
 0xf7b   :  { %v1527_v60 = vpop.xlane.xlu0 %1526 }
 0xf7c   :  { %vm1533_vm8 = vweird.f32 %v1527_v60  ;;  %v1537_v25 = vand.u32 2147483647, %v1527_v60 }
 0xf7e   :  { %vm1538_vm10 = vcmp.eq.f32.partialorder %v1537_v25, 8.507059e+37 }
 0xf83   :  { %v3041_v47 = vpop.xlane.xlu2 %1763 }
 0xf8b   :  { %v1679_v50 = vpop.xlane.xlu2 %1678 }
 0xf8c   :  { %v1680_v4 = vsub.f32 %v1676_v22, %v1679_v50  ;;  %v1539_v22 = vand.u32 2147483648, %v1527_v60 }
 0xf8e   :  { %v1681_v53 = vmul.f32 1.442695, %v1680_v4  ;;  %v1540_v30 = vor.u32 1.1754944e-38, %v1539_v22 }
 0xf90   :  { %2218 = vpow2.f32 %v1681_v53 }
 0xf91   :  { %2220 = vrcp.f32 %v1527_v60 }
 0xf93   :  { %v1451_v57 = vpop.permute.xlu2 %1450 }
 0xf94   :  { %1471 = vmatpush.msrb.mxu3 %v1451_v57  ;;  %v1776_v57 = vand.u32 2147483648, %v3041_v47 }
 0xf95   :  { %2097 = vmatmul.msk.f32.vlgmr.msrb.gmra.mxu3 %vm260_vm2, %v1449_v17 }
 0xf96   :  { %v3045_v20 = vpop.eup %2218 }
 0xf97   :  { %v1683_v46 = vsel %vm260_vm2, %v3045_v20, 0.0  ;;  %v2221_v61 = vpop.eup %2220 }
 0xf98   :  { %1684 = vadd.xlane.f32.xlu0 %v1683_v46  ;;  %v1529_v55 = vmul.f32 %v2221_v61, %v1527_v60  ;;  %vm1534_vm5 = vweird.f32 %v2221_v61  ;;  %v1774_v46 = vand.u32 2147483647, %v3041_v47 }
 0xf99   :  { %vm1535_vm9 = vmor %vm1533_vm8, %vm1534_vm5 }
 0xf9a   :  { %v1530_v48 = vsub.f32 1.0, %v1529_v55  ;;  %v1777_v55 = vor.u32 1.1754944e-38, %v1776_v57 }
 0xf9c   :  { %v1531_v14 = vmul.f32 %v2221_v61, %v1530_v48 }
 0xf9e   :  { %v1532_v10 = vadd.f32 %v2221_v61, %v1531_v14 }
 0xfa0   :  { %v1536_v29 = vsel %vm1535_vm9, %v2221_v61, %v1532_v10  ;;  %vm1770_vm9 = vweird.f32 %v3041_v47 }
 0xfa1   :  { %v1541_v31 = vsel %vm1538_vm10, %v1540_v30, %v1536_v29 }
 0xfa2   :  { %v1542_v32 = vmul.f32 %v3022_v11, %v1541_v31 }
 0xfa8   :  { %v1315_v59 = vpop.f32.mrf.mxu3 }
 0xfac   :  { %1622 = vrot.lane.b32.xlu0 %v2947_v58, %s2439_s28 }
 0xfb4   :  { %1477 = vrot.lane.b32.xlu0 %v1315_v59, %s2430_s27 }
 0xfcc   :  { %v1355_v9 = vpop.xlane.xlu2 %1354 }
 0xfcd   :  { %2222 = vrcp.f32 %v1355_v9  ;;  %v1367_v13 = vand.u32 2147483648, %v1355_v9  ;;  %v1365_v18 = vand.u32 2147483647, %v1355_v9  ;;  %vm1361_vm3 = vweird.f32 %v1355_v9 }
 0xfce   :  { %2224 = vrcp.f32 %v3039_v12 }
 0xfcf   :  { %v1368_v58 = vor.u32 1.1754944e-38, %v1367_v13  ;;  %vm1366_vm7 = vcmp.eq.f32.partialorder %v1365_v18, 8.507059e+37  ;;  %2226 = vrcp.f32 %v3041_v47 }
 0xfd3   :  { %v2223_v7 = vpop.eup %2222 }
 0xfd4   :  { %v1357_v26 = vmul.f32 %v2223_v7, %v1355_v9  ;;  %vm1362_vm14 = vweird.f32 %v2223_v7  ;;  %v2225_v34 = vpop.eup %2224  ;;  %v1781_v61 = vpop.permute.xlu2 %1780 }
 0xfd5   :  { %vm1363_vm4 = vmor %vm1361_vm3, %vm1362_vm14  ;;  %v1608_v35 = vmul.f32 %v2225_v34, %v3039_v12  ;;  %v2227_v11 = vpop.eup %2226  ;;  %vm1613_vm11 = vweird.f32 %v2225_v34 }
 0xfd6   :  { %v1358_v42 = vsub.f32 1.0, %v1357_v26  ;;  %vm1614_vm13 = vmor %vm1612_vm12, %vm1613_vm11  ;;  %vm1771_vm8 = vweird.f32 %v2227_v11  ;;  %vm1775_vm11 = vcmp.eq.f32.partialorder %v1774_v46, 8.507059e+37 }
 0xfd7   :  { %v1609_v37 = vsub.f32 1.0, %v1608_v35  ;;  %vm1772_vm10 = vmor %vm1770_vm9, %vm1771_vm8 }
 0xfd8   :  { %v1359_v15 = vmul.f32 %v2223_v7, %v1358_v42 }
 0xfd9   :  { %v1610_v1 = vmul.f32 %v2225_v34, %v1609_v37 }
 0xfda   :  { %v1360_v19 = vadd.f32 %v2223_v7, %v1359_v15 }
 0xfdc   :  { %v1364_v6 = vsel %vm1363_vm4, %v2223_v7, %v1360_v19  ;;  %vm1617_vm4 = vcmp.eq.f32.partialorder %v1616_v21, 8.507059e+37 }
 0xfdd   :  { %v1369_v24 = vsel %vm1366_vm7, %v1368_v58, %v1364_v6 }
 0xfde   :  { %v1370_v27 = vmul.f32 %v2215_v39, %v1369_v24  ;;  %v1611_v39 = vadd.f32 %v2225_v34, %v1610_v1 }
 0xfe0   :  { %2094 = vmatmul.msk.f32.vlgmr.msra.gmra.mxu2 %vm260_vm2, %v1370_v27  ;;  %v1615_v3 = vsel %vm1614_vm13, %v2225_v34, %v1611_v39  ;;  %v2243_v27 = vld [vmem:[#allocation7] ss:$0 sm:$0xff] }
 0xfe1   :  { %1722 = vmatpush.msra.mxu2 %v1702_v28 }
 0xfe8   :  { %2100 = vmatmul.msk.f32.vlgmr.msrb.gmra.mxu2 %vm260_vm2, %v1542_v32 }
 0xfe9   :  { %1918 = vmatpush.msrb.mxu2 %v2784_v62  ;;  %v1766_v62 = vmul.f32 %v2227_v11, %v3041_v47 }
 0xfeb   :  { %1919 = vmatpush.msrb.mxu2 %v2790_v51 }
 0xfed   :  { %1920 = vmatpush.msrb.mxu2 %v2796_v63  ;;  %v1767_v63 = vsub.f32 1.0, %v1766_v62 }
 0xfef   :  { %1921 = vmatpush.msrb.mxu2 %v2801_v0  ;;  %v1618_v0 = vand.u32 2147483648, %v3039_v12  ;;  %v1768_v44 = vmul.f32 %v2227_v11, %v1767_v63 }
 0xff1   :  { %v1619_v50 = vor.u32 1.1754944e-38, %v1618_v0  ;;  %v1769_v12 = vadd.f32 %v2227_v11, %v1768_v44 }
 0xff3   :  { %v1620_v23 = vsel %vm1617_vm4, %v1619_v50, %v1615_v3  ;;  %v1773_v9 = vsel %vm1772_vm10, %v2227_v11, %v1769_v12 }
 0xff4   :  { %v1621_v60 = vmul.f32 %v3016_v52, %v1620_v23  ;;  %v1778_v7 = vsel %vm1775_vm11, %v1777_v55, %v1773_v9  ;;  %v2245_v23 = vld [vmem:[%s3136_s8] ss:$0 sm:$0xff] }
0x100b   :  { %v1685_v36 = vpop.xlane.xlu0 %1684 }
0x100c   :  { %2228 = vrcp.f32 %v1685_v36  ;;  %v1697_v41 = vand.u32 2147483648, %v1685_v36  ;;  %v1695_v8 = vand.u32 2147483647, %v1685_v36  ;;  %vm1691_vm3 = vweird.f32 %v1685_v36 }
0x100e   :  { %v1698_v33 = vor.u32 1.1754944e-38, %v1697_v41  ;;  %vm1696_vm7 = vcmp.eq.f32.partialorder %v1695_v8, 8.507059e+37 }
0x1012   :  { %v2229_v2 = vpop.eup %2228 }
0x1013   :  { %v1687_v51 = vmul.f32 %v2229_v2, %v1685_v36  ;;  %vm1692_vm14 = vweird.f32 %v2229_v2 }
0x1014   :  { %vm1693_vm5 = vmor %vm1691_vm3, %vm1692_vm14 }
0x1015   :  { %v1688_v40 = vsub.f32 1.0, %v1687_v51 }
0x1017   :  { %v1689_v45 = vmul.f32 %v2229_v2, %v1688_v40 }
0x1018   :  { %v1473_v49 = vpop.f32.mrf.mxu3 }
0x1019   :  { %v1690_v4 = vadd.f32 %v2229_v2, %v1689_v45  ;;  %1485 = vrot.lane.b32.xlu2 %v1473_v49, %s2448_s18 }
0x101b   :  { %v1694_v53 = vsel %vm1693_vm5, %v2229_v2, %v1690_v4  ;;  %v2244_v4 = vld [vmem:[%s3135_s7] ss:$0 sm:$0xff] }
0x101c   :  { %v1699_v43 = vsel %vm1696_vm7, %v1698_v33, %v1694_v53 }
0x101d   :  { %v1700_v17 = vmul.f32 %v3045_v20, %v1699_v43  ;;  %v1779_v20 = vmul.f32 %v3026_v16, %v1778_v7 }
0x101e   :  { %v1623_v59 = vpop.permute.xlu0 %1622 }
0x101f   :  { %1643 = vmatpush.msra.mxu3 %v1623_v59  ;;  %2106 = vmatmul.msk.f32.vlgmr.msra.gmra.mxu2 %vm260_vm2, %v1700_v17 }
0x1020   :  { %2103 = vmatmul.msk.f32.vlgmr.msra.gmra.mxu3 %vm260_vm2, %v1621_v60 }
0x1021   :  { %1801 = vmatpush.msrb.mxu3 %v1781_v61 }
0x1026   :  { %v1478_v13 = vpop.permute.xlu0 %1477 }
0x1027   :  { %v1488_v14 = vsel %vm260_vm2, %v2993_v38, %v1478_v13 }
0x1028   :  { %2109 = vmatmul.msk.f32.vlgmr.msrb.gmra.mxu3 %vm260_vm2, %v1779_v20 }
0x1063   :  { %v1394_v47 = vpop.f32.mrf.mxu2 }
0x1064   :  { %1481 = vrot.lane.b32.xlu1 %v1394_v47, %s2447_s17 }
0x106b   :  { %v1566_v52 = vpop.f32.mrf.mxu2 }
0x1073   :  { %v1486_v15 = vpop.permute.xlu2 %1485 }
0x10a2   :  { %v1724_v48 = vpop.f32.mrf.mxu2 }
0x10a3   :  { %v1645_v26 = vpop.f32.mrf.mxu3  ;;  %1811 = vrot.lane.b32.xlu1 %v1724_v48, %s2447_s17  ;;  %v2246_v48 = vld [vmem:[#allocation8] ss:$0 sm:$0xff] }
0x10a4   :  { %1807 = vrot.lane.b32.xlu0 %v1645_v26, %s2430_s27 }
0x10ab   :  { %v1803_v42 = vpop.f32.mrf.mxu3 }
0x10ac   :  { %1815 = vrot.lane.b32.xlu2 %v1803_v42, %s2448_s18 }
0x10d6   :  { %v1482_v16 = vpop.permute.xlu1 %1481 }
0x10d7   :  { %v1489_v18 = vsel %vm197_vm0, %v1488_v14, %v1482_v16 }
0x10d8   :  { %v1490_v19 = vsel %vm587_vm6, %v1489_v18, %v1486_v15 }
0x10d9   :  { %2110 = vmatmul.msk.f32.vlgmr.msrb.gmra.mxu0 %vm227_vm1, %v1490_v19 }
0x1106   :  { %v1816_v22 = vpop.permute.xlu2 %1815 }
0x1115   :  { %v1812_v10 = vpop.permute.xlu1 %1811 }
0x1116   :  { %v1808_v58 = vpop.permute.xlu0 %1807 }
0x1117   :  { %v1818_v6 = vsel %vm260_vm2, %v1566_v52, %v1808_v58 }
0x1118   :  { %v1819_v24 = vsel %vm197_vm0, %v1818_v6, %v1812_v10 }
0x1119   :  { %v1820_v25 = vsel %vm587_vm6, %v1819_v24, %v1816_v22 }
0x111a   :  { %2111 = vmatmul.msk.f32.gmra.mxu0 %vm227_vm1, %v1820_v25 }
0x1156   :  { %v1844_v38 = vpop.f32.mrf.mxu0 }
0x1157   :  { %v1845_v28 = vadd.f32 %v2243_v27, %v1844_v38 }
0x1159   :  { %v1850_v29 = vadd.f32 %v1845_v28, %v2900_v54 }
0x115b   :  { %v1852_v30 = vsel %vm227_vm1, %v1850_v29, 0.0 }
0x115c   :  { %1853 = vadd.xlane.f32.xlu0 %v1852_v30 }
0x1197   :  { %v1847_v31 = vpop.f32.mrf.mxu0 }
0x1198   :  { %v1848_v32 = vadd.f32 %v2243_v27, %v1847_v31 }
0x119a   :  { %v1851_v34 = vadd.f32 %v1848_v32, %v2940_v5 }
0x119c   :  { %v1855_v35 = vsel %vm227_vm1, %v1851_v34, 0.0 }
0x119d   :  { %1856 = vadd.xlane.f32.xlu1 %v1855_v35  ;;  %v2247_v35 = vld [vmem:[#allocation10] ss:$0 sm:$0xff] }
0x11cf   :  { %v1854_v36 = vpop.xlane.xlu0 %1853 }
0x11d0   :  { %v1858_v37 = vmul.f32 %v1854_v36, %v2773_v56 }
0x11d2   :  { %v1860_v11 = vsub.f32 %v1850_v29, %v1858_v37 }
0x11d4   :  { %v1862_v1 = vmul.f32 %v1860_v11, %v1860_v11 }
0x11d6   :  { %v1864_v62 = vsel %vm227_vm1, %v1862_v1, 0.0 }
0x11d7   :  { %1865 = vadd.xlane.f32.xlu2 %v1864_v62 }
0x1210   :  { %v1857_v2 = vpop.xlane.xlu1 %1856 }
0x1211   :  { %v1859_v54 = vmul.f32 %v1857_v2, %v2773_v56 }
0x1213   :  { %v1861_v51 = vsub.f32 %v1851_v34, %v1859_v54 }
0x1215   :  { %v1863_v39 = vmul.f32 %v1861_v51, %v1861_v51 }
0x1217   :  { %v1867_v63 = vsel %vm227_vm1, %v1863_v39, 0.0 }
0x1218   :  { %1868 = vadd.xlane.f32.xlu0 %v1867_v63 }
0x124a   :  { %v1866_v5 = vpop.xlane.xlu2 %1865 }
0x124b   :  { %v1870_v0 = vmul.f32 %v1866_v5, %v2773_v56 }
0x124d   :  { %v1872_v40 = vadd.f32 1e-12, %v1870_v0 }
0x124f   :  { %2230 = vrsqrt.f32 %v1872_v40  ;;  %vm1880_vm2 = vweird.f32 %v1872_v40 }
0x1255   :  { %v2231_v21 = vpop.eup %2230 }
0x1256   :  { %v1875_v41 = vmul.f32 %v2231_v21, %v1872_v40  ;;  %vm1881_vm0 = vweird.f32 %v2231_v21 }
0x1257   :  { %vm1882_vm6 = vmor %vm1880_vm2, %vm1881_vm0 }
0x1258   :  { %v1876_v45 = vmul.f32 %v2231_v21, %v1875_v41 }
0x125a   :  { %v1877_v8 = vmul.f32 0.5, %v1876_v45 }
0x125c   :  { %v1878_v3 = vsub.f32 1.5, %v1877_v8 }
0x125e   :  { %v1879_v44 = vmul.f32 %v2231_v21, %v1878_v3 }
0x1260   :  { %v1883_v49 = vsel %vm1882_vm6, %v2231_v21, %v1879_v44 }
0x1261   :  { %v1894_v50 = vmul.f32 %v1883_v49, %v1860_v11 }
0x1263   :  { %v1896_v33 = vmul.f32 %v2244_v4, %v1894_v50 }
0x1265   :  { %v1898_v53 = vadd.f32 %v2245_v23, %v1896_v33 }
0x1267   :  { %2112 = vmatmul.msk.f32.vlgmr.msrb.gmra.mxu2 %vm227_vm1, %v1898_v53 }
0x128b   :  { %v1869_v12 = vpop.xlane.xlu0 %1868 }
0x128c   :  { %v1871_v43 = vmul.f32 %v1869_v12, %v2773_v56 }
0x128e   :  { %v1873_v57 = vadd.f32 1e-12, %v1871_v43 }
0x1290   :  { %2232 = vrsqrt.f32 %v1873_v57  ;;  %vm1890_vm13 = vweird.f32 %v1873_v57 }
0x1296   :  { %v2233_v17 = vpop.eup %2232 }
0x1297   :  { %v1885_v46 = vmul.f32 %v2233_v17, %v1873_v57  ;;  %vm1891_vm12 = vweird.f32 %v2233_v17 }
0x1298   :  { %vm1892_vm14 = vmor %vm1890_vm13, %vm1891_vm12 }
0x1299   :  { %v1886_v59 = vmul.f32 %v2233_v17, %v1885_v46 }
0x129b   :  { %v1887_v60 = vmul.f32 0.5, %v1886_v59  ;;  %v2249_v59 = vld [vmem:[#allocation11] ss:$0 sm:$0xff] }
0x129d   :  { %v1888_v9 = vsub.f32 1.5, %v1887_v60 }
0x129f   :  { %v1889_v61 = vmul.f32 %v2233_v17, %v1888_v9 }
0x12a1   :  { %v1893_v55 = vsel %vm1892_vm14, %v2233_v17, %v1889_v61  ;;  %v2248_v17 = vld [vmem:[%s3141_s13] ss:$0 sm:$0xff]  ;;  %s2450_s13 = smov [#allocation13]  }
0x12a2   :  { %v1895_v7 = vmul.f32 %v1893_v55, %v1861_v51  ;;  %s2032_s28 = sshll.u32 %s2450_s13, 4  ;;  %s2033_s28 = int_to_ptr.vmem [resolvable:$true] %s2032_s28 }
0x12a4   :  { %v1897_v20 = vmul.f32 %v2244_v4, %v1895_v7 }
0x12a6   :  { %v1899_v47 = vadd.f32 %v2245_v23, %v1897_v20 }
0x12a8   :  { %2113 = vmatmul.msk.f32.gmra.mxu2 %vm227_vm1, %v1899_v47 }
0x12ea   :  { %v1923_v52 = vpop.f32.mrf.mxu2 }
0x12eb   :  { %v1924_v26 = vadd.f32 %v2246_v48, %v1923_v52 }
0x12ed   :  { %v1931_v42 = vmul.f32 0.044715, %v1924_v26  ;;  %v1929_v19 = vmul.f32 0.5, %v1924_v26 }
0x12ef   :  { %v1933_v13 = vmul.f32 %v1931_v42, %v1924_v26 }
0x12f1   :  { %v1935_v14 = vmul.f32 %v1933_v13, %v1924_v26 }
0x12f3   :  { %v1937_v16 = vadd.f32 %v1935_v14, %v1924_v26 }
0x12f5   :  { %v1939_v15 = vmul.f32 0.7978846, %v1937_v16 }
0x12f7   :  { %2234 = vtanh.f32 %v1939_v15 }
0x12fd   :  { %v2235_v18 = vpop.eup %2234 }
0x12fe   :  { %v1943_v58 = vadd.f32 1.0, %v2235_v18 }
0x1300   :  { %v1945_v10 = vmul.f32 %v1943_v58, %v1929_v19 }
0x1302   :  { %2114 = vmatmul.msk.f32.vlgmr.msrb.gmra.mxu1 %vm1052_vm15, %v1945_v10 }
0x132b   :  { %v1926_v6 = vpop.f32.mrf.mxu2 }
0x132c   :  { %v1927_v22 = vadd.f32 %v2246_v48, %v1926_v6 }
0x132e   :  { %v1932_v24 = vmul.f32 0.044715, %v1927_v22  ;;  %v1930_v30 = vmul.f32 0.5, %v1927_v22 }
0x1330   :  { %v1934_v25 = vmul.f32 %v1932_v24, %v1927_v22 }
0x1332   :  { %v1936_v38 = vmul.f32 %v1934_v25, %v1927_v22 }
0x1334   :  { %v1938_v27 = vadd.f32 %v1936_v38, %v1927_v22 }
0x1336   :  { %v1940_v28 = vmul.f32 0.7978846, %v1938_v27 }
0x1338   :  { %2236 = vtanh.f32 %v1940_v28 }
0x133e   :  { %v2237_v29 = vpop.eup %2236 }
0x133f   :  { %v1944_v31 = vadd.f32 1.0, %v2237_v29 }
0x1341   :  { %v1946_v32 = vmul.f32 %v1944_v31, %v1930_v30 }
0x1343   :  { %2115 = vmatmul.msk.f32.gmra.mxu1 %vm1052_vm15, %v1946_v32 }
0x137f   :  { %v1970_v34 = vpop.f32.mrf.mxu1 }
0x1380   :  { %v1971_v36 = vadd.f32 %v2247_v35, %v1970_v34 }
0x1382   :  { %v1976_v37 = vadd.f32 %v1971_v36, %v1898_v53 }
0x1384   :  { %v1978_v11 = vsel %vm227_vm1, %v1976_v37, 0.0 }
0x1385   :  { %1979 = vadd.xlane.f32.xlu1 %v1978_v11 }
0x13c0   :  { %v1973_v1 = vpop.f32.mrf.mxu1 }
0x13c1   :  { %v1974_v62 = vadd.f32 %v2247_v35, %v1973_v1 }
0x13c3   :  { %v1977_v2 = vadd.f32 %v1974_v62, %v1899_v47 }
0x13c5   :  { %v1981_v54 = vsel %vm227_vm1, %v1977_v2, 0.0 }
0x13c6   :  { %1982 = vadd.xlane.f32.xlu2 %v1981_v54 }
0x13f8   :  { %v1980_v51 = vpop.xlane.xlu1 %1979 }
0x13f9   :  { %v1984_v39 = vmul.f32 %v1980_v51, %v2773_v56 }
0x13fb   :  { %v1986_v63 = vsub.f32 %v1976_v37, %v1984_v39 }
0x13fd   :  { %v1988_v5 = vmul.f32 %v1986_v63, %v1986_v63 }
0x13ff   :  { %v1990_v0 = vsel %vm227_vm1, %v1988_v5, 0.0 }
0x1400   :  { %1991 = vadd.xlane.f32.xlu0 %v1990_v0 }
0x1439   :  { %v1983_v40 = vpop.xlane.xlu2 %1982 }
0x143a   :  { %v1985_v21 = vmul.f32 %v1983_v40, %v2773_v56 }
0x143c   :  { %v1987_v41 = vsub.f32 %v1977_v2, %v1985_v21 }
0x143e   :  { %v1989_v45 = vmul.f32 %v1987_v41, %v1987_v41 }
0x1440   :  { %v1993_v8 = vsel %vm227_vm1, %v1989_v45, 0.0 }
0x1441   :  { %1994 = vadd.xlane.f32.xlu1 %v1993_v8 }
0x1473   :  { %v1992_v3 = vpop.xlane.xlu0 %1991 }
0x1474   :  { %v1996_v44 = vmul.f32 %v1992_v3, %v2773_v56 }
0x1476   :  { %v1998_v49 = vadd.f32 1e-12, %v1996_v44 }
0x1478   :  { %2238 = vrsqrt.f32 %v1998_v49  ;;  %vm2006_vm3 = vweird.f32 %v1998_v49 }
0x147e   :  { %v2239_v50 = vpop.eup %2238 }
0x147f   :  { %v2001_v4 = vmul.f32 %v2239_v50, %v1998_v49  ;;  %vm2007_vm15 = vweird.f32 %v2239_v50 }
0x1480   :  { %vm2008_vm4 = vmor %vm2006_vm3, %vm2007_vm15 }
0x1481   :  { %v2002_v33 = vmul.f32 %v2239_v50, %v2001_v4 }
0x1483   :  { %v2003_v23 = vmul.f32 0.5, %v2002_v33 }
0x1485   :  { %v2004_v53 = vsub.f32 1.5, %v2003_v23 }
0x1487   :  { %v2005_v12 = vmul.f32 %v2239_v50, %v2004_v53 }
0x1489   :  { %v2009_v43 = vsel %vm2008_vm4, %v2239_v50, %v2005_v12 }
0x148a   :  { %v2020_v57 = vmul.f32 %v2009_v43, %v1986_v63 }
0x148c   :  { %v2022_v46 = vmul.f32 %v2248_v17, %v2020_v57 }
0x148e   :  { %v2024_v60 = vadd.f32 %v2249_v59, %v2022_v46 }
0x1490   :  { %2026 = vst.msk [vmem:[#allocation13] sm:$0xff] %vm227_vm1, %v2024_v60 }
0x14b4   :  { %v1995_v9 = vpop.xlane.xlu1 %1994 }
0x14b5   :  { %v1997_v61 = vmul.f32 %v1995_v9, %v2773_v56 }
0x14b7   :  { %v1999_v55 = vadd.f32 1e-12, %v1997_v61 }
0x14b9   :  { %2240 = vrsqrt.f32 %v1999_v55  ;;  %vm2016_vm7 = vweird.f32 %v1999_v55 }
0x14bf   :  { %v2241_v7 = vpop.eup %2240 }
0x14c0   :  { %v2011_v20 = vmul.f32 %v2241_v7, %v1999_v55  ;;  %vm2017_vm5 = vweird.f32 %v2241_v7 }
0x14c1   :  { %vm2018_vm8 = vmor %vm2016_vm7, %vm2017_vm5 }
0x14c2   :  { %v2012_v47 = vmul.f32 %v2241_v7, %v2011_v20 }
0x14c4   :  { %v2013_v52 = vmul.f32 0.5, %v2012_v47 }
0x14c6   :  { %v2014_v48 = vsub.f32 1.5, %v2013_v52 }
0x14c8   :  { %v2015_v26 = vmul.f32 %v2241_v7, %v2014_v48 }
0x14ca   :  { %v2019_v42 = vsel %vm2018_vm8, %v2241_v7, %v2015_v26 }
0x14cb   :  { %v2021_v13 = vmul.f32 %v2019_v42, %v1987_v41 }
0x14cd   :  { %v2023_v56 = vmul.f32 %v2248_v17, %v2021_v13 }
0x14cf   :  { %v2025_v14 = vadd.f32 %v2249_v59, %v2023_v56 }
0x14d1   :  { %2027 = vst.msk [vmem:[#allocation13 + $0x8] sm:$0xff] %vm227_vm1, %v2025_v14 }
0x14d2   :  { %2040 = dma.vmem_to_hbm [thread:$0]  %s2033_s28, 256, %s2035_s30, [#allocation4], %s2429_s26, %s2429_s26, %s2430_s27  }
0x14d3   :  { %2426 = dma.done.wait [#allocation4], 256  }
0x14d4   :  { %2427 = vsyncadd [#allocation4], 4294967040 }
0x14d5   :  { %2045 = vsyncpa [#allocation3], 1 }
0x14d6   :  { %2046 = vsyncpa [#allocation6], 1 }
0x14d7   :  { %2047 = vsyncpa [#allocation9], 1 }
0x14d8   :  { %2048 = vsyncpa [#allocation12], 1 }
0x14d9   :  { %2049 = vsyncpa [#allocation4], 1 }

</bundles_post_ra>
